<compile_context>
chip_gen: v7x
topology: tpu7x:2x2x1
jax: 0.10.0
libtpu: 0.0.40
codegen_flags: <defaults>
</compile_context>

<pallas_src>
import functools
import math

import jax
import jax.numpy as jnp
from jax import lax
from jax.experimental import pallas as pl
from jax.experimental.pallas import tpu as pltpu

# Activation / matmul-weight storage dtype.  All accumulation, LayerNorm
# statistics, softmax and transcendental math is f32 (v5e-safe).
ACT_DTYPE = jnp.bfloat16

# Weight slabs up to this many bytes stay whole (K untiled) and VMEM-resident
# across the M grid axis (constant BlockSpec index -> one DMA total).
_RESIDENT_WEIGHT_BYTES = 24 * 1024 * 1024


@functools.lru_cache(maxsize=1)
def _vmem_limit_bytes():
    """Generation-aware scoped-VMEM budget: ~3/4 of physical VMEM
    (v5e/v6e: ~96 MiB of 128, v7x: 48 MiB of 64), 48 MiB fallback."""
    try:
        cap = getattr(pltpu.get_tpu_info(), "vmem_capacity_bytes", None)
        if cap:
            return int(min(cap * 3 // 4, 100 * 1024 * 1024))
    except Exception:
        pass
    return 48 * 1024 * 1024


def _compiler_params(dimension_semantics):
    return pltpu.CompilerParams(dimension_semantics=dimension_semantics,
                                vmem_limit_bytes=_vmem_limit_bytes())


def _pick_tile(dim, target, quantum, fallback_cap=8192):
    """Largest tile <= target that divides `dim` and is a multiple of
    `quantum`.  If no such divisor exists, only fall back to the full dim when
    it is small enough to be VMEM-safe; otherwise fail loudly (pad upstream)."""
    if dim <= target:
        return dim
    t = (target // quantum) * quantum
    while t >= quantum:
        if dim % t == 0:
            return t
        t -= quantum
    if dim > fallback_cap:
        raise ValueError(
            f"_pick_tile: no tile <= {target} (multiple of {quantum}) divides "
            f"{dim}; pad this dimension in the wrapper instead of emitting a "
            f"{dim}-wide block (VMEM blow-up).")
    return dim


# ----------------------------------------------------------------------------
# Dense (+ optional GELU/tanh, + optional fused residual-add + LayerNorm)
# ----------------------------------------------------------------------------
def _dense_epilogue(y, activation, res_ref, g_ref, bt_ref, ln_eps):
    if activation == "gelu":
        # exact-erf GELU (pytorch-pretrained-bert parity)
        y = 0.5 * y * (1.0 + lax.erf(y * (1.0 / math.sqrt(2.0))))
    elif activation == "tanh":
        y = jnp.tanh(y)
    if res_ref is not None:
        y = y + res_ref[...].astype(jnp.float32)
    if g_ref is not None:
        mean = jnp.mean(y, axis=-1, keepdims=True)
        var = jnp.mean(jnp.square(y - mean), axis=-1, keepdims=True)
        y = (y - mean) * lax.rsqrt(var + ln_eps)
        y = y * g_ref[...].astype(jnp.float32) + bt_ref[...].astype(jnp.float32)
    return y


def _dense_resident_kernel(*refs, activation, has_residual, has_ln, ln_eps):
    # refs = (x, w, b, [residual], [ln_gamma, ln_beta], out)
    x_ref, w_ref, b_ref = refs[0], refs[1], refs[2]
    idx = 3
    res_ref = g_ref = bt_ref = None
    if has_residual:
        res_ref = refs[idx]
        idx += 1
    if has_ln:
        g_ref, bt_ref = refs[idx], refs[idx + 1]
        idx += 2
    o_ref = refs[idx]

    y = jnp.dot(x_ref[...], w_ref[...], preferred_element_type=jnp.float32)
    y = y + b_ref[...].astype(jnp.float32)
    y = _dense_epilogue(y, activation, res_ref, g_ref, bt_ref, ln_eps)
    o_ref[...] = y.astype(o_ref.dtype)


def _dense_ktiled_kernel(*refs, activation, has_residual, has_ln, ln_eps):
    # refs = (x, w, b, [residual], [ln_gamma, ln_beta], out, acc_scratch)
    x_ref, w_ref, b_ref = refs[0], refs[1], refs[2]
    idx = 3
    res_ref = g_ref = bt_ref = None
    if has_residual:
        res_ref = refs[idx]
        idx += 1
    if has_ln:
        g_ref, bt_ref = refs[idx], refs[idx + 1]
        idx += 2
    o_ref, acc_ref = refs[idx], refs[idx + 1]

    k = pl.program_id(1)

    @pl.when(k == 0)
    def _():
        acc_ref[...] = jnp.zeros_like(acc_ref)

    acc_ref[...] += jnp.dot(x_ref[...], w_ref[...],
                            preferred_element_type=jnp.float32)

    @pl.when(k == pl.num_programs(1) - 1)
    def _():
        y = acc_ref[...] + b_ref[...].astype(jnp.float32)
        y = _dense_epilogue(y, activation, res_ref, g_ref, bt_ref, ln_eps)
        o_ref[...] = y.astype(o_ref.dtype)


def dense(x, w, b, *, activation=None, residual=None, ln=None, ln_eps=1e-12,
          out_dtype=None, tm_target=256, tk_target=1024):
    """y = [LayerNorm](act(x @ w + b) [+ residual]).

    x: [M, K], w: [K, N], b: [N]; residual: [M, N] or None;
    ln: (gamma[N], beta[N]) or None.  Returns [M, N] in out_dtype.

    If the (K, N) weight slab fits the residency budget, the grid is
    (M/tm,) with the weight resident in VMEM (constant BlockSpec index ->
    one DMA total); otherwise an (M/tm, K/tk) reduction grid with an f32
    accumulator is used.  N (and the LayerNorm axis) stays whole and
    lane-dense in every block.
    """
    M, K = x.shape
    N = w.shape[1]
    out_dtype = out_dtype or ACT_DTYPE

    sub_q = 16 if x.dtype == jnp.bfloat16 else 8      # bf16 packs 2/sublane
    tm = _pick_tile(M, tm_target, sub_q)

    weight_bytes = int(K * N * w.dtype.itemsize)
    resident = weight_bytes <= _RESIDENT_WEIGHT_BYTES

    common = dict(activation=activation, has_residual=residual is not None,
                  has_ln=ln is not None, ln_eps=ln_eps)
    flops = 2 * M * K * N
    transcendentals = M * N if activation in ("gelu", "tanh") else 0
    res_bytes = int(residual.size * residual.dtype.itemsize) if residual is not None else 0
    out_bytes = int(M * N * jnp.dtype(out_dtype).itemsize)
    x_bytes = int(x.size * x.dtype.itemsize)

    inputs = [x, w, b.reshape(1, N)]

    if resident:
        grid = (M // tm,)
        in_specs = [
            pl.BlockSpec((tm, K), lambda i: (i, 0)),
            pl.BlockSpec((K, N), lambda i: (0, 0)),   # resident: single DMA
            pl.BlockSpec((1, N), lambda i: (0, 0)),
        ]
        if residual is not None:
            inputs.append(residual)
            in_specs.append(pl.BlockSpec((tm, N), lambda i: (i, 0)))
        if ln is not None:
            g, bt = ln
            inputs += [g.reshape(1, N), bt.reshape(1, N)]
            in_specs += [pl.BlockSpec((1, N), lambda i: (0, 0)),
                         pl.BlockSpec((1, N), lambda i: (0, 0))]
        kernel = functools.partial(_dense_resident_kernel, **common)
        out_specs = pl.BlockSpec((tm, N), lambda i: (i, 0))
        scratch = []
        dims = ("parallel",)
        bytes_accessed = x_bytes + weight_bytes + 4 * N + res_bytes + out_bytes
    else:
        tk = _pick_tile(K, tk_target, 128)
        grid = (M // tm, K // tk)
        in_specs = [
            pl.BlockSpec((tm, tk), lambda i, kk: (i, kk)),
            pl.BlockSpec((tk, N), lambda i, kk: (kk, 0)),
            pl.BlockSpec((1, N), lambda i, kk: (0, 0)),
        ]
        if residual is not None:
            inputs.append(residual)
            in_specs.append(pl.BlockSpec((tm, N), lambda i, kk: (i, 0)))
        if ln is not None:
            g, bt = ln
            inputs += [g.reshape(1, N), bt.reshape(1, N)]
            in_specs += [pl.BlockSpec((1, N), lambda i, kk: (0, 0)),
                         pl.BlockSpec((1, N), lambda i, kk: (0, 0))]
        kernel = functools.partial(_dense_ktiled_kernel, **common)
        out_specs = pl.BlockSpec((tm, N), lambda i, kk: (i, 0))
        scratch = [pltpu.VMEM((tm, N), jnp.float32)]
        dims = ("parallel", "arbitrary")
        # weight re-streamed once per M tile in this fallback path
        bytes_accessed = (x_bytes + weight_bytes * (M // tm) + 4 * N
                          + res_bytes + out_bytes)

    return pl.pallas_call(
        kernel,
        out_shape=jax.ShapeDtypeStruct((M, N), out_dtype),
        grid=grid,
        in_specs=in_specs,
        out_specs=out_specs,
        scratch_shapes=scratch,
        compiler_params=_compiler_params(dims),
        cost_estimate=pl.CostEstimate(flops=flops,
                                      transcendentals=transcendentals,
                                      bytes_accessed=int(bytes_accessed)),
    )(*inputs)


# ----------------------------------------------------------------------------
# Embedding sum + LayerNorm fused (pos/type add folded into the LN kernel so
# the f32 [B, S, H] sum never round-trips through HBM)
# ----------------------------------------------------------------------------
def _emb_layernorm_kernel(word_ref, pt_ref, g_ref, b_ref, o_ref, *, eps):
    x = word_ref[0].astype(jnp.float32) + pt_ref[...].astype(jnp.float32)
    mean = jnp.mean(x, axis=-1, keepdims=True)
    var = jnp.mean(jnp.square(x - mean), axis=-1, keepdims=True)
    y = (x - mean) * lax.rsqrt(var + eps)
    y = y * g_ref[...].astype(jnp.float32) + b_ref[...].astype(jnp.float32)
    o_ref[0] = y.astype(o_ref.dtype)


def embed_layernorm(word_emb, pos_type, gamma, beta, *, eps=1e-12,
                    out_dtype=None, ts_target=256):
    """LayerNorm(word_emb[b, s] + pos_type[s]) -> [B, S, H] in out_dtype."""
    B, S, H = word_emb.shape
    out_dtype = out_dtype or ACT_DTYPE
    ts = _pick_tile(S, ts_target, 8)
    return pl.pallas_call(
        functools.partial(_emb_layernorm_kernel, eps=eps),
        out_shape=jax.ShapeDtypeStruct((B, S, H), out_dtype),
        grid=(B, S // ts),
        in_specs=[pl.BlockSpec((1, ts, H), lambda b, s: (b, s, 0)),
                  pl.BlockSpec((ts, H), lambda b, s: (s, 0)),
                  pl.BlockSpec((1, H), lambda b, s: (0, 0)),
                  pl.BlockSpec((1, H), lambda b, s: (0, 0))],
        out_specs=pl.BlockSpec((1, ts, H), lambda b, s: (b, s, 0)),
        compiler_params=_compiler_params(("parallel", "parallel")),
        cost_estimate=pl.CostEstimate(
            flops=9 * B * S * H, transcendentals=B * S,
            bytes_accessed=int(word_emb.size * word_emb.dtype.itemsize
                               + pos_type.size * pos_type.dtype.itemsize
                               + B * S * H * jnp.dtype(out_dtype).itemsize)),
    )(word_emb, pos_type, gamma.reshape(1, H), beta.reshape(1, H))


# ----------------------------------------------------------------------------
# Multi-head self-attention.  Grid = (batch, query tiles); the fused QKV block
# for a batch element stays resident across its query tiles.  Heads are split
# and merged in-kernel with direct per-head stores (no concatenate relayout).
# Mask is all-ones -> omitted.
# ----------------------------------------------------------------------------
def _attention_kernel(qkv_ref, o_ref, *, num_heads, scale, tq):
    S = qkv_ref.shape[1]
    H = qkv_ref.shape[2] // 3
    Dh = H // num_heads
    qi = pl.program_id(1)
    row = pl.multiple_of(qi * tq, tq)

    # TODO(synk): for head_dim < 128 the per-head lane slices below are not
    # vreg-lane-aligned (possible relayout); a head-major QKV layout or
    # head-pair batching would remove it.
    for h in range(num_heads):                         # static unrolled loop
        q_h = qkv_ref[0, pl.ds(row, tq), h * Dh:(h + 1) * Dh]
        k_h = qkv_ref[0, :, H + h * Dh:H + (h + 1) * Dh]
        v_h = qkv_ref[0, :, 2 * H + h * Dh:2 * H + (h + 1) * Dh]
        # q @ k^T without a materialized transpose: contract the Dh dims.
        s = lax.dot_general(q_h, k_h, (((1,), (1,)), ((), ())),
                            preferred_element_type=jnp.float32) * scale
        s = s - jnp.max(s, axis=-1, keepdims=True)
        p = jnp.exp(s)
        p = p * pl.reciprocal(jnp.sum(p, axis=-1, keepdims=True), approx=True)
        ctx = jnp.dot(p.astype(v_h.dtype), v_h,
                      preferred_element_type=jnp.float32)
        # direct per-head store -> no concatenate, shortest live ranges
        o_ref[0, :, h * Dh:(h + 1) * Dh] = ctx.astype(o_ref.dtype)


def attention(qkv, num_heads, *, tq_target=128):
    """qkv: [B, S, 3H] fused Q|K|V projections -> context [B, S, H]."""
    B, S, H3 = qkv.shape
    H = H3 // 3
    Dh = H // num_heads
    scale = 1.0 / math.sqrt(Dh)
    sub_q = 16 if qkv.dtype == jnp.bfloat16 else 8
    tq = _pick_tile(S, tq_target, sub_q)
    flops = 4 * B * num_heads * S * S * Dh
    return pl.pallas_call(
        functools.partial(_attention_kernel, num_heads=num_heads, scale=scale,
                          tq=tq),
        out_shape=jax.ShapeDtypeStruct((B, S, H), qkv.dtype),
        grid=(B, S // tq),
        in_specs=[pl.BlockSpec((1, S, H3), lambda b, qi: (b, 0, 0))],
        out_specs=pl.BlockSpec((1, tq, H), lambda b, qi: (b, qi, 0)),
        compiler_params=_compiler_params(("parallel", "parallel")),
        cost_estimate=pl.CostEstimate(
            flops=flops,
            transcendentals=B * num_heads * S * S,
            bytes_accessed=int((qkv.size + B * S * H) * qkv.dtype.itemsize)),
    )(qkv)


# ----------------------------------------------------------------------------
# BERT model (glue in plain JAX, compute in the kernels above)
# ----------------------------------------------------------------------------
CFG = dict(vocab=100, hidden=32, heads=2, layers=2, intermediate=64, max_pos=64)


def init_params(key, cfg):
    H, I, V, P = cfg["hidden"], cfg["intermediate"], cfg["vocab"], cfg["max_pos"]

    def nrm(k, shape):
        return 0.02 * jax.random.normal(k, shape, dtype=jnp.float32)

    keys = iter(jax.random.split(key, 8 + 8 * cfg["layers"]))
    p = {
        "word_emb": nrm(next(keys), (V, H)),
        "pos_emb": nrm(next(keys), (P, H)),
        "type_emb": nrm(next(keys), (2, H)),
        "emb_ln_g": jnp.ones((H,), jnp.float32),
        "emb_ln_b": jnp.zeros((H,), jnp.float32),
        "pool_w": nrm(next(keys), (H, H)),
        "pool_b": jnp.zeros((H,), jnp.float32),
        "layers": [],
    }
    for _ in range(cfg["layers"]):
        lyr = {
            # Wq|Wk|Wv concatenated -> one [H, 3H] projection per layer
            "w_qkv": nrm(next(keys), (H, 3 * H)),
            "b_qkv": jnp.zeros((3 * H,), jnp.float32),
            "wo": nrm(next(keys), (H, H)), "bo": jnp.zeros((H,), jnp.float32),
            "attn_ln_g": jnp.ones((H,), jnp.float32),
            "attn_ln_b": jnp.zeros((H,), jnp.float32),
            "wi": nrm(next(keys), (H, I)), "bi": jnp.zeros((I,), jnp.float32),
            "wo2": nrm(next(keys), (I, H)), "bo2": jnp.zeros((H,), jnp.float32),
            "out_ln_g": jnp.ones((H,), jnp.float32),
            "out_ln_b": jnp.zeros((H,), jnp.float32),
        }
        p["layers"].append(lyr)
    return p


def prepare_params(params):
    """Cast matmul weights to the compute dtype (bf16).  Biases, LayerNorm
    params and embedding tables stay f32 (stats / sums done in f32)."""
    def cast_layer(lyr):
        out = dict(lyr)
        for name in ("w_qkv", "wo", "wi", "wo2"):
            out[name] = lyr[name].astype(ACT_DTYPE)
        return out
    out = dict(params)
    out["pool_w"] = params["pool_w"].astype(ACT_DTYPE)
    out["layers"] = [cast_layer(l) for l in params["layers"]]
    return out


def bert_encoder_forward(params, input_ids, cfg):
    B, S = input_ids.shape
    H, nH = cfg["hidden"], cfg["heads"]
    M = B * S

    # --- embeddings: data-dependent gather kept as JAX glue; position/type
    # add + LayerNorm fused into one kernel (no f32 [B,S,H] HBM round-trip) ---
    word = params["word_emb"][input_ids]                       # [B, S, H] f32
    pos_type = params["pos_emb"][:S] + params["type_emb"][0][None, :]  # [S, H]
    x = embed_layernorm(word, pos_type,
                        params["emb_ln_g"], params["emb_ln_b"])
    x = x.reshape(M, H)
    # Reference forward passes no attention_mask -> all-ones mask -> additive
    # mask is identically 0, so no mask tensor is plumbed into the kernels.

    for lyr in params["layers"]:
        # fused QKV projection: one [M, 3H] dense instead of three [M, H]
        qkv = dense(x, lyr["w_qkv"], lyr["b_qkv"])             # [M, 3H]
        ctx = attention(qkv.reshape(B, S, 3 * H), nH)          # [B, S, H]
        ctx = ctx.reshape(M, H)
        # output projection + residual add + LayerNorm fused in one kernel
        x = dense(ctx, lyr["wo"], lyr["bo"], residual=x,
                  ln=(lyr["attn_ln_g"], lyr["attn_ln_b"]))
        # FFN: intermediate (erf-GELU fused), then output + residual + LN
        # fused; larger M tiles amortize the per-step epilogue / overhead.
        inter = dense(x, lyr["wi"], lyr["bi"], activation="gelu",
                      tm_target=512)
        x = dense(inter, lyr["wo2"], lyr["bo2"], residual=x,
                  ln=(lyr["out_ln_g"], lyr["out_ln_b"]), tm_target=512)

    # --- pooler: tanh(W @ hidden[:, 0] + b) ---
    cls = x.reshape(B, S, H)[:, 0, :]                          # [B, H]
    pooled = dense(cls, params["pool_w"], params["pool_b"],
                   activation="tanh", out_dtype=jnp.float32)
    return pooled                                              # [B, H] f32


if __name__ == "__main__":
    key = jax.random.PRNGKey(0)
    k_param, k_input = jax.random.split(key)

    B, S = 2, 8
    params = prepare_params(init_params(k_param, CFG))
    input_ids = jax.random.randint(k_input, (B, S), 0, CFG["vocab"],
                                   dtype=jnp.int32)

    fwd = jax.jit(functools.partial(bert_encoder_forward, cfg=CFG))
    out = fwd(params, input_ids)
    jax.block_until_ready(out)

    assert out.shape == (B, CFG["hidden"]) and out.dtype == jnp.float32
    assert bool(jnp.all(jnp.isfinite(out)))
    print("KERNEL_OK")
</pallas_src>

<mosaic_0001>
module attributes {stable_mosaic.version = 11 : i64} {
  func.func @_dense_resident_kernel(%arg0: i32, %arg1: memref<16x32xbf16, #tpu.memory_space<vmem>>, %arg2: memref<32x96xbf16, #tpu.memory_space<vmem>>, %arg3: memref<1x96xf32, #tpu.memory_space<vmem>>, %arg4: memref<16x96xbf16, #tpu.memory_space<vmem>>) attributes {dimension_semantics = [#tpu.dimension_semantics<parallel>], iteration_bounds = array<i64: 1>, scalar_prefetch = 0 : i64, scratch_operands = 0 : i64, tpu.core_type = #tpu.core_type<tc>, window_params = [{transform_indices = @transform_0, window_bounds = array<i64: 16, 32>}, {pipeline_mode = #tpu.pipeline_mode<synchronous>, transform_indices = @transform_1, window_bounds = array<i64: 32, 96>}, {pipeline_mode = #tpu.pipeline_mode<synchronous>, transform_indices = @transform_2, window_bounds = array<i64: 1, 96>}, {transform_indices = @transform_3, window_bounds = array<i64: 16, 96>}]} {
    %c0 = arith.constant 0 : index
    %c0_0 = arith.constant 0 : index
    %0 = vector.load %arg1[%c0, %c0_0] : memref<16x32xbf16, #tpu.memory_space<vmem>>, vector<16x32xbf16>
    %c0_1 = arith.constant 0 : index
    %c0_2 = arith.constant 0 : index
    %1 = vector.load %arg2[%c0_1, %c0_2] : memref<32x96xbf16, #tpu.memory_space<vmem>>, vector<32x96xbf16>
    %cst = arith.constant dense<0.000000e+00> : vector<16x96xf32>
    %2 = tpu.matmul %0, %1, %cst {dimension_numbers = #tpu.dot_dimension_numbers<[1], [0], [0], [1], [0, 0, 1, 1], [], []>} : vector<16x32xbf16>, vector<32x96xbf16>, vector<16x96xf32> -> vector<16x96xf32>
    %c0_3 = arith.constant 0 : index
    %c0_4 = arith.constant 0 : index
    %3 = vector.load %arg3[%c0_3, %c0_4] : memref<1x96xf32, #tpu.memory_space<vmem>>, vector<1x96xf32>
    %4 = vector.broadcast %3 : vector<1x96xf32> to vector<16x96xf32>
    %5 = arith.addf %2, %4 : vector<16x96xf32>
    %6 = arith.truncf %5 : vector<16x96xf32> to vector<16x96xbf16>
    %c0_5 = arith.constant 0 : index
    %c0_6 = arith.constant 0 : index
    %7 = vector.load %arg4[%c0_5, %c0_6] : memref<16x96xbf16, #tpu.memory_space<vmem>>, vector<16x96xbf16>
    tpu.vector_store %arg4[%c0_5, %c0_6], %6 {strides = array<i32>} : memref<16x96xbf16, #tpu.memory_space<vmem>>, vector<16x96xbf16>,
    return
  }
  func.func @transform_0(%arg0: i32) -> (i32, i32) {
    %c0_i32 = arith.constant 0 : i32
    %c0_i32_0 = arith.constant 0 : i32
    return %arg0, %c0_i32 : i32, i32
  }
  func.func @transform_1(%arg0: i32) -> (i32, i32) {
    %c0_i32 = arith.constant 0 : i32
    %c0_i32_0 = arith.constant 0 : i32
    %c0_i32_1 = arith.constant 0 : i32
    return %c0_i32, %c0_i32_0 : i32, i32
  }
  func.func @transform_2(%arg0: i32) -> (i32, i32) {
    %c0_i32 = arith.constant 0 : i32
    %c0_i32_0 = arith.constant 0 : i32
    %c0_i32_1 = arith.constant 0 : i32
    return %c0_i32, %c0_i32_0 : i32, i32
  }
  func.func @transform_3(%arg0: i32) -> (i32, i32) {
    %c0_i32 = arith.constant 0 : i32
    %c0_i32_0 = arith.constant 0 : i32
    return %arg0, %c0_i32 : i32, i32
  }
}

module attributes {stable_mosaic.version = 11 : i64} {
  func.func @_emb_layernorm_kernel(%arg0: i32, %arg1: i32, %arg2: memref<1x8x32xf32, #tpu.memory_space<vmem>>, %arg3: memref<8x32xf32, #tpu.memory_space<vmem>>, %arg4: memref<1x32xf32, #tpu.memory_space<vmem>>, %arg5: memref<1x32xf32, #tpu.memory_space<vmem>>, %arg6: memref<1x8x32xbf16, #tpu.memory_space<vmem>>) attributes {dimension_semantics = [#tpu.dimension_semantics<parallel>, #tpu.dimension_semantics<parallel>], iteration_bounds = array<i64: 2, 1>, scalar_prefetch = 0 : i64, scratch_operands = 0 : i64, tpu.core_type = #tpu.core_type<tc>, window_params = [{transform_indices = @transform_0, window_bounds = array<i64: 1, 8, 32>}, {transform_indices = @transform_1, window_bounds = array<i64: 8, 32>}, {pipeline_mode = #tpu.pipeline_mode<synchronous>, transform_indices = @transform_2, window_bounds = array<i64: 1, 32>}, {pipeline_mode = #tpu.pipeline_mode<synchronous>, transform_indices = @transform_3, window_bounds = array<i64: 1, 32>}, {transform_indices = @transform_4, window_bounds = array<i64: 1, 8, 32>}]} {
    %c0 = arith.constant 0 : index
    %c0_0 = arith.constant 0 : index
    %c0_1 = arith.constant 0 : index
    %0 = vector.load %arg2[%c0, %c0_0, %c0_1] : memref<1x8x32xf32, #tpu.memory_space<vmem>>, vector<1x8x32xf32>
    %1 = vector.shape_cast %0 : vector<1x8x32xf32> to vector<8x32xf32>
    %c0_2 = arith.constant 0 : index
    %c0_3 = arith.constant 0 : index
    %2 = vector.load %arg3[%c0_2, %c0_3] : memref<8x32xf32, #tpu.memory_space<vmem>>, vector<8x32xf32>
    %3 = arith.addf %1, %2 : vector<8x32xf32>
    %cst = arith.constant dense<0.000000e+00> : vector<8xf32>
    %4 = vector.multi_reduction <add>, %3, %cst [1] : vector<8x32xf32> to vector<8xf32>
    %5 = vector.shape_cast %4 : vector<8xf32> to vector<8x1xf32>
    %cst_4 = arith.constant 3.200000e+01 : f32
    %6 = vector.broadcast %cst_4 : f32 to vector<8x1xf32>
    %7 = arith.divf %5, %6 : vector<8x1xf32>
    %8 = vector.broadcast %7 : vector<8x1xf32> to vector<8x32xf32>
    %9 = arith.subf %3, %8 : vector<8x32xf32>
    %10 = arith.mulf %9, %9 : vector<8x32xf32>
    %cst_5 = arith.constant dense<0.000000e+00> : vector<8xf32>
    %11 = vector.multi_reduction <add>, %10, %cst_5 [1] : vector<8x32xf32> to vector<8xf32>
    %12 = vector.shape_cast %11 : vector<8xf32> to vector<8x1xf32>
    %cst_6 = arith.constant 3.200000e+01 : f32
    %13 = vector.broadcast %cst_6 : f32 to vector<8x1xf32>
    %14 = arith.divf %12, %13 : vector<8x1xf32>
    %15 = vector.broadcast %7 : vector<8x1xf32> to vector<8x32xf32>
    %16 = arith.subf %3, %15 : vector<8x32xf32>
    %cst_7 = arith.constant 9.99999996E-13 : f32
    %17 = vector.broadcast %cst_7 : f32 to vector<8x1xf32>
    %18 = arith.addf %14, %17 : vector<8x1xf32>
    %19 = math.rsqrt %18 : vector<8x1xf32>
    %20 = vector.broadcast %19 : vector<8x1xf32> to vector<8x32xf32>
    %21 = arith.mulf %16, %20 : vector<8x32xf32>
    %c0_8 = arith.constant 0 : index
    %c0_9 = arith.constant 0 : index
    %22 = vector.load %arg4[%c0_8, %c0_9] : memref<1x32xf32, #tpu.memory_space<vmem>>, vector<1x32xf32>
    %23 = vector.broadcast %22 : vector<1x32xf32> to vector<8x32xf32>
    %24 = arith.mulf %21, %23 : vector<8x32xf32>
    %c0_10 = arith.constant 0 : index
    %c0_11 = arith.constant 0 : index
    %25 = vector.load %arg5[%c0_10, %c0_11] : memref<1x32xf32, #tpu.memory_space<vmem>>, vector<1x32xf32>
    %26 = vector.broadcast %25 : vector<1x32xf32> to vector<8x32xf32>
    %27 = arith.addf %24, %26 : vector<8x32xf32>
    %28 = arith.truncf %27 : vector<8x32xf32> to vector<8x32xbf16>
    %c0_12 = arith.constant 0 : index
    %c0_13 = arith.constant 0 : index
    %c0_14 = arith.constant 0 : index
    %29 = vector.load %arg6[%c0_12, %c0_13, %c0_14] : memref<1x8x32xbf16, #tpu.memory_space<vmem>>, vector<1x8x32xbf16>
    %30 = vector.shape_cast %29 : vector<1x8x32xbf16> to vector<8x32xbf16>
    %31 = vector.shape_cast %28 : vector<8x32xbf16> to vector<1x8x32xbf16>
    tpu.vector_store %arg6[%c0_12, %c0_13, %c0_14], %31 {strides = array<i32>} : memref<1x8x32xbf16, #tpu.memory_space<vmem>>, vector<1x8x32xbf16>,
    return
  }
  func.func @transform_0(%arg0: i32, %arg1: i32) -> (i32, i32, i32) {
    %c0_i32 = arith.constant 0 : i32
    %c0_i32_0 = arith.constant 0 : i32
    return %arg0, %arg1, %c0_i32 : i32, i32, i32
  }
  func.func @transform_1(%arg0: i32, %arg1: i32) -> (i32, i32) {
    %c0_i32 = arith.constant 0 : i32
    %c0_i32_0 = arith.constant 0 : i32
    return %arg1, %c0_i32 : i32, i32
  }
  func.func @transform_2(%arg0: i32, %arg1: i32) -> (i32, i32) {
    %c0_i32 = arith.constant 0 : i32
    %c0_i32_0 = arith.constant 0 : i32
    %c0_i32_1 = arith.constant 0 : i32
    return %c0_i32, %c0_i32_0 : i32, i32
  }
  func.func @transform_3(%arg0: i32, %arg1: i32) -> (i32, i32) {
    %c0_i32 = arith.constant 0 : i32
    %c0_i32_0 = arith.constant 0 : i32
    %c0_i32_1 = arith.constant 0 : i32
    return %c0_i32, %c0_i32_0 : i32, i32
  }
  func.func @transform_4(%arg0: i32, %arg1: i32) -> (i32, i32, i32) {
    %c0_i32 = arith.constant 0 : i32
    %c0_i32_0 = arith.constant 0 : i32
    return %arg0, %arg1, %c0_i32 : i32, i32, i32
  }
}

module attributes {stable_mosaic.version = 11 : i64} {
  func.func @_dense_resident_kernel(%arg0: i32, %arg1: memref<16x32xbf16, #tpu.memory_space<vmem>>, %arg2: memref<32x32xbf16, #tpu.memory_space<vmem>>, %arg3: memref<1x32xf32, #tpu.memory_space<vmem>>, %arg4: memref<16x32xbf16, #tpu.memory_space<vmem>>, %arg5: memref<1x32xf32, #tpu.memory_space<vmem>>, %arg6: memref<1x32xf32, #tpu.memory_space<vmem>>, %arg7: memref<16x32xbf16, #tpu.memory_space<vmem>>) attributes {dimension_semantics = [#tpu.dimension_semantics<parallel>], iteration_bounds = array<i64: 1>, scalar_prefetch = 0 : i64, scratch_operands = 0 : i64, tpu.core_type = #tpu.core_type<tc>, window_params = [{transform_indices = @transform_0, window_bounds = array<i64: 16, 32>}, {pipeline_mode = #tpu.pipeline_mode<synchronous>, transform_indices = @transform_1, window_bounds = array<i64: 32, 32>}, {pipeline_mode = #tpu.pipeline_mode<synchronous>, transform_indices = @transform_2, window_bounds = array<i64: 1, 32>}, {transform_indices = @transform_3, window_bounds = array<i64: 16, 32>}, {pipeline_mode = #tpu.pipeline_mode<synchronous>, transform_indices = @transform_4, window_bounds = array<i64: 1, 32>}, {pipeline_mode = #tpu.pipeline_mode<synchronous>, transform_indices = @transform_5, window_bounds = array<i64: 1, 32>}, {transform_indices = @transform_6, window_bounds = array<i64: 16, 32>}]} {
    %c0 = arith.constant 0 : index
    %c0_0 = arith.constant 0 : index
    %0 = vector.load %arg1[%c0, %c0_0] : memref<16x32xbf16, #tpu.memory_space<vmem>>, vector<16x32xbf16>
    %c0_1 = arith.constant 0 : index
    %c0_2 = arith.constant 0 : index
    %1 = vector.load %arg2[%c0_1, %c0_2] : memref<32x32xbf16, #tpu.memory_space<vmem>>, vector<32x32xbf16>
    %cst = arith.constant dense<0.000000e+00> : vector<16x32xf32>
    %2 = tpu.matmul %0, %1, %cst {dimension_numbers = #tpu.dot_dimension_numbers<[1], [0], [0], [1], [0, 0, 1, 1], [], []>} : vector<16x32xbf16>, vector<32x32xbf16>, vector<16x32xf32> -> vector<16x32xf32>
    %c0_3 = arith.constant 0 : index
    %c0_4 = arith.constant 0 : index
    %3 = vector.load %arg3[%c0_3, %c0_4] : memref<1x32xf32, #tpu.memory_space<vmem>>, vector<1x32xf32>
    %4 = vector.broadcast %3 : vector<1x32xf32> to vector<16x32xf32>
    %5 = arith.addf %2, %4 : vector<16x32xf32>
    %c0_5 = arith.constant 0 : index
    %c0_6 = arith.constant 0 : index
    %6 = vector.load %arg4[%c0_5, %c0_6] : memref<16x32xbf16, #tpu.memory_space<vmem>>, vector<16x32xbf16>
    %7 = arith.extf %6 : vector<16x32xbf16> to vector<16x32xf32>
    %8 = arith.addf %5, %7 : vector<16x32xf32>
    %cst_7 = arith.constant dense<0.000000e+00> : vector<16xf32>
    %9 = vector.multi_reduction <add>, %8, %cst_7 [1] : vector<16x32xf32> to vector<16xf32>
    %10 = vector.shape_cast %9 : vector<16xf32> to vector<16x1xf32>
    %cst_8 = arith.constant 3.200000e+01 : f32
    %11 = vector.broadcast %cst_8 : f32 to vector<16x1xf32>
    %12 = arith.divf %10, %11 : vector<16x1xf32>
    %13 = vector.broadcast %12 : vector<16x1xf32> to vector<16x32xf32>
    %14 = arith.subf %8, %13 : vector<16x32xf32>
    %15 = arith.mulf %14, %14 : vector<16x32xf32>
    %cst_9 = arith.constant dense<0.000000e+00> : vector<16xf32>
    %16 = vector.multi_reduction <add>, %15, %cst_9 [1] : vector<16x32xf32> to vector<16xf32>
    %17 = vector.shape_cast %16 : vector<16xf32> to vector<16x1xf32>
    %cst_10 = arith.constant 3.200000e+01 : f32
    %18 = vector.broadcast %cst_10 : f32 to vector<16x1xf32>
    %19 = arith.divf %17, %18 : vector<16x1xf32>
    %20 = vector.broadcast %12 : vector<16x1xf32> to vector<16x32xf32>
    %21 = arith.subf %8, %20 : vector<16x32xf32>
    %cst_11 = arith.constant 9.99999996E-13 : f32
    %22 = vector.broadcast %cst_11 : f32 to vector<16x1xf32>
    %23 = arith.addf %19, %22 : vector<16x1xf32>
    %24 = math.rsqrt %23 : vector<16x1xf32>
    %25 = vector.broadcast %24 : vector<16x1xf32> to vector<16x32xf32>
    %26 = arith.mulf %21, %25 : vector<16x32xf32>
    %c0_12 = arith.constant 0 : index
    %c0_13 = arith.constant 0 : index
    %27 = vector.load %arg5[%c0_12, %c0_13] : memref<1x32xf32, #tpu.memory_space<vmem>>, vector<1x32xf32>
    %28 = vector.broadcast %27 : vector<1x32xf32> to vector<16x32xf32>
    %29 = arith.mulf %26, %28 : vector<16x32xf32>
    %c0_14 = arith.constant 0 : index
    %c0_15 = arith.constant 0 : index
    %30 = vector.load %arg6[%c0_14, %c0_15] : memref<1x32xf32, #tpu.memory_space<vmem>>, vector<1x32xf32>
    %31 = vector.broadcast %30 : vector<1x32xf32> to vector<16x32xf32>
    %32 = arith.addf %29, %31 : vector<16x32xf32>
    %33 = arith.truncf %32 : vector<16x32xf32> to vector<16x32xbf16>
    %c0_16 = arith.constant 0 : index
    %c0_17 = arith.constant 0 : index
    %34 = vector.load %arg7[%c0_16, %c0_17] : memref<16x32xbf16, #tpu.memory_space<vmem>>, vector<16x32xbf16>
    tpu.vector_store %arg7[%c0_16, %c0_17], %33 {strides = array<i32>} : memref<16x32xbf16, #tpu.memory_space<vmem>>, vector<16x32xbf16>,
    return
  }
  func.func @transform_0(%arg0: i32) -> (i32, i32) {
    %c0_i32 = arith.constant 0 : i32
    %c0_i32_0 = arith.constant 0 : i32
    return %arg0, %c0_i32 : i32, i32
  }
  func.func @transform_1(%arg0: i32) -> (i32, i32) {
    %c0_i32 = arith.constant 0 : i32
    %c0_i32_0 = arith.constant 0 : i32
    %c0_i32_1 = arith.constant 0 : i32
    return %c0_i32, %c0_i32_0 : i32, i32
  }
  func.func @transform_2(%arg0: i32) -> (i32, i32) {
    %c0_i32 = arith.constant 0 : i32
    %c0_i32_0 = arith.constant 0 : i32
    %c0_i32_1 = arith.constant 0 : i32
    return %c0_i32, %c0_i32_0 : i32, i32
  }
  func.func @transform_3(%arg0: i32) -> (i32, i32) {
    %c0_i32 = arith.constant 0 : i32
    %c0_i32_0 = arith.constant 0 : i32
    return %arg0, %c0_i32 : i32, i32
  }
  func.func @transform_4(%arg0: i32) -> (i32, i32) {
    %c0_i32 = arith.constant 0 : i32
    %c0_i32_0 = arith.constant 0 : i32
    %c0_i32_1 = arith.constant 0 : i32
    return %c0_i32, %c0_i32_0 : i32, i32
  }
  func.func @transform_5(%arg0: i32) -> (i32, i32) {
    %c0_i32 = arith.constant 0 : i32
    %c0_i32_0 = arith.constant 0 : i32
    %c0_i32_1 = arith.constant 0 : i32
    return %c0_i32, %c0_i32_0 : i32, i32
  }
  func.func @transform_6(%arg0: i32) -> (i32, i32) {
    %c0_i32 = arith.constant 0 : i32
    %c0_i32_0 = arith.constant 0 : i32
    return %arg0, %c0_i32 : i32, i32
  }
}

module attributes {stable_mosaic.version = 11 : i64} {
  func.func @_attention_kernel(%arg0: i32, %arg1: i32, %arg2: memref<1x8x96xbf16, #tpu.memory_space<vmem>>, %arg3: memref<1x8x32xbf16, #tpu.memory_space<vmem>>) attributes {dimension_semantics = [#tpu.dimension_semantics<parallel>, #tpu.dimension_semantics<parallel>], iteration_bounds = array<i64: 2, 1>, scalar_prefetch = 0 : i64, scratch_operands = 0 : i64, tpu.core_type = #tpu.core_type<tc>, window_params = [{transform_indices = @transform_0, window_bounds = array<i64: 1, 8, 96>}, {transform_indices = @transform_1, window_bounds = array<i64: 1, 8, 32>}]} {
    %c8_i32 = arith.constant 8 : i32
    %0 = arith.muli %arg1, %c8_i32 : i32
    %1 = tpu.assume_multiple %0, 8 : i32
    %c0 = arith.constant 0 : index
    %2 = arith.index_cast %1 : i32 to index
    %c0_0 = arith.constant 0 : index
    %3 = vector.load %arg2[%c0, %2, %c0_0] : memref<1x8x96xbf16, #tpu.memory_space<vmem>>, vector<1x8x16xbf16>
    %4 = vector.shape_cast %3 : vector<1x8x16xbf16> to vector<8x16xbf16>
    %c0_1 = arith.constant 0 : index
    %c0_2 = arith.constant 0 : index
    %c32 = arith.constant 32 : index
    %5 = vector.load %arg2[%c0_1, %c0_2, %c32] : memref<1x8x96xbf16, #tpu.memory_space<vmem>>, vector<1x8x16xbf16>
    %6 = vector.shape_cast %5 : vector<1x8x16xbf16> to vector<8x16xbf16>
    %c0_3 = arith.constant 0 : index
    %c0_4 = arith.constant 0 : index
    %c64 = arith.constant 64 : index
    %7 = vector.load %arg2[%c0_3, %c0_4, %c64] : memref<1x8x96xbf16, #tpu.memory_space<vmem>>, vector<1x8x16xbf16>
    %8 = vector.shape_cast %7 : vector<1x8x16xbf16> to vector<8x16xbf16>
    %cst = arith.constant dense<0.000000e+00> : vector<8x8xf32>
    %9 = tpu.matmul %4, %6, %cst {dimension_numbers = #tpu.dot_dimension_numbers<[1], [1], [0], [0], [0, 0, 1, 0], [], []>} : vector<8x16xbf16>, vector<8x16xbf16>, vector<8x8xf32> -> vector<8x8xf32>
    %cst_5 = arith.constant 2.500000e-01 : f32
    %10 = vector.broadcast %cst_5 : f32 to vector<8x8xf32>
    %11 = arith.mulf %9, %10 : vector<8x8xf32>
    %cst_6 = arith.constant dense<0xFF800000> : vector<8xf32>
    %12 = vector.multi_reduction <maximumf>, %11, %cst_6 [1] : vector<8x8xf32> to vector<8xf32>
    %13 = vector.shape_cast %12 : vector<8xf32> to vector<8x1xf32>
    %14 = vector.broadcast %13 : vector<8x1xf32> to vector<8x8xf32>
    %15 = arith.subf %11, %14 : vector<8x8xf32>
    %16 = math.exp %15 : vector<8x8xf32>
    %cst_7 = arith.constant dense<0.000000e+00> : vector<8xf32>
    %17 = vector.multi_reduction <add>, %16, %cst_7 [1] : vector<8x8xf32> to vector<8xf32>
    %18 = vector.shape_cast %17 : vector<8xf32> to vector<8x1xf32>
    %19 = tpu.reciprocal %18 {approx = true} : vector<8x1xf32> -> vector<8x1xf32>
    %20 = vector.broadcast %19 : vector<8x1xf32> to vector<8x8xf32>
    %21 = arith.mulf %16, %20 : vector<8x8xf32>
    %22 = arith.truncf %21 : vector<8x8xf32> to vector<8x8xbf16>
    %cst_8 = arith.constant dense<0.000000e+00> : vector<8x16xf32>
    %23 = tpu.matmul %22, %8, %cst_8 {dimension_numbers = #tpu.dot_dimension_numbers<[1], [0], [0], [1], [0, 0, 1, 1], [], []>} : vector<8x8xbf16>, vector<8x16xbf16>, vector<8x16xf32> -> vector<8x16xf32>
    %24 = arith.truncf %23 : vector<8x16xf32> to vector<8x16xbf16>
    %c0_9 = arith.constant 0 : index
    %c0_10 = arith.constant 0 : index
    %c0_11 = arith.constant 0 : index
    %25 = vector.load %arg3[%c0_9, %c0_10, %c0_11] : memref<1x8x32xbf16, #tpu.memory_space<vmem>>, vector<1x8x16xbf16>
    %26 = vector.shape_cast %25 : vector<1x8x16xbf16> to vector<8x16xbf16>
    %27 = vector.shape_cast %24 : vector<8x16xbf16> to vector<1x8x16xbf16>
    tpu.vector_store %arg3[%c0_9, %c0_10, %c0_11], %27 {strides = array<i32>} : memref<1x8x32xbf16, #tpu.memory_space<vmem>>, vector<1x8x16xbf16>,
    %c0_12 = arith.constant 0 : index
    %28 = arith.index_cast %1 : i32 to index
    %c16 = arith.constant 16 : index
    %29 = vector.load %arg2[%c0_12, %28, %c16] : memref<1x8x96xbf16, #tpu.memory_space<vmem>>, vector<1x8x16xbf16>
    %30 = vector.shape_cast %29 : vector<1x8x16xbf16> to vector<8x16xbf16>
    %c0_13 = arith.constant 0 : index
    %c0_14 = arith.constant 0 : index
    %c48 = arith.constant 48 : index
    %31 = vector.load %arg2[%c0_13, %c0_14, %c48] : memref<1x8x96xbf16, #tpu.memory_space<vmem>>, vector<1x8x16xbf16>
    %32 = vector.shape_cast %31 : vector<1x8x16xbf16> to vector<8x16xbf16>
    %c0_15 = arith.constant 0 : index
    %c0_16 = arith.constant 0 : index
    %c80 = arith.constant 80 : index
    %33 = vector.load %arg2[%c0_15, %c0_16, %c80] : memref<1x8x96xbf16, #tpu.memory_space<vmem>>, vector<1x8x16xbf16>
    %34 = vector.shape_cast %33 : vector<1x8x16xbf16> to vector<8x16xbf16>
    %cst_17 = arith.constant dense<0.000000e+00> : vector<8x8xf32>
    %35 = tpu.matmul %30, %32, %cst_17 {dimension_numbers = #tpu.dot_dimension_numbers<[1], [1], [0], [0], [0, 0, 1, 0], [], []>} : vector<8x16xbf16>, vector<8x16xbf16>, vector<8x8xf32> -> vector<8x8xf32>
    %cst_18 = arith.constant 2.500000e-01 : f32
    %36 = vector.broadcast %cst_18 : f32 to vector<8x8xf32>
    %37 = arith.mulf %35, %36 : vector<8x8xf32>
    %cst_19 = arith.constant dense<0xFF800000> : vector<8xf32>
    %38 = vector.multi_reduction <maximumf>, %37, %cst_19 [1] : vector<8x8xf32> to vector<8xf32>
    %39 = vector.shape_cast %38 : vector<8xf32> to vector<8x1xf32>
    %40 = vector.broadcast %39 : vector<8x1xf32> to vector<8x8xf32>
    %41 = arith.subf %37, %40 : vector<8x8xf32>
    %42 = math.exp %41 : vector<8x8xf32>
    %cst_20 = arith.constant dense<0.000000e+00> : vector<8xf32>
    %43 = vector.multi_reduction <add>, %42, %cst_20 [1] : vector<8x8xf32> to vector<8xf32>
    %44 = vector.shape_cast %43 : vector<8xf32> to vector<8x1xf32>
    %45 = tpu.reciprocal %44 {approx = true} : vector<8x1xf32> -> vector<8x1xf32>
    %46 = vector.broadcast %45 : vector<8x1xf32> to vector<8x8xf32>
    %47 = arith.mulf %42, %46 : vector<8x8xf32>
    %48 = arith.truncf %47 : vector<8x8xf32> to vector<8x8xbf16>
    %cst_21 = arith.constant dense<0.000000e+00> : vector<8x16xf32>
    %49 = tpu.matmul %48, %34, %cst_21 {dimension_numbers = #tpu.dot_dimension_numbers<[1], [0], [0], [1], [0, 0, 1, 1], [], []>} : vector<8x8xbf16>, vector<8x16xbf16>, vector<8x16xf32> -> vector<8x16xf32>
    %50 = arith.truncf %49 : vector<8x16xf32> to vector<8x16xbf16>
    %c0_22 = arith.constant 0 : index
    %c0_23 = arith.constant 0 : index
    %c16_24 = arith.constant 16 : index
    %51 = vector.load %arg3[%c0_22, %c0_23, %c16_24] : memref<1x8x32xbf16, #tpu.memory_space<vmem>>, vector<1x8x16xbf16>
    %52 = vector.shape_cast %51 : vector<1x8x16xbf16> to vector<8x16xbf16>
    %53 = vector.shape_cast %50 : vector<8x16xbf16> to vector<1x8x16xbf16>
    tpu.vector_store %arg3[%c0_22, %c0_23, %c16_24], %53 {strides = array<i32>} : memref<1x8x32xbf16, #tpu.memory_space<vmem>>, vector<1x8x16xbf16>,
    return
  }
  func.func @transform_0(%arg0: i32, %arg1: i32) -> (i32, i32, i32) {
    %c0_i32 = arith.constant 0 : i32
    %c0_i32_0 = arith.constant 0 : i32
    %c0_i32_1 = arith.constant 0 : i32
    return %arg0, %c0_i32, %c0_i32_0 : i32, i32, i32
  }
  func.func @transform_1(%arg0: i32, %arg1: i32) -> (i32, i32, i32) {
    %c0_i32 = arith.constant 0 : i32
    %c0_i32_0 = arith.constant 0 : i32
    return %arg0, %arg1, %c0_i32 : i32, i32, i32
  }
}

module attributes {stable_mosaic.version = 11 : i64} {
  func.func @_dense_resident_kernel(%arg0: i32, %arg1: memref<16x32xbf16, #tpu.memory_space<vmem>>, %arg2: memref<32x64xbf16, #tpu.memory_space<vmem>>, %arg3: memref<1x64xf32, #tpu.memory_space<vmem>>, %arg4: memref<16x64xbf16, #tpu.memory_space<vmem>>) attributes {dimension_semantics = [#tpu.dimension_semantics<parallel>], iteration_bounds = array<i64: 1>, scalar_prefetch = 0 : i64, scratch_operands = 0 : i64, tpu.core_type = #tpu.core_type<tc>, window_params = [{transform_indices = @transform_0, window_bounds = array<i64: 16, 32>}, {pipeline_mode = #tpu.pipeline_mode<synchronous>, transform_indices = @transform_1, window_bounds = array<i64: 32, 64>}, {pipeline_mode = #tpu.pipeline_mode<synchronous>, transform_indices = @transform_2, window_bounds = array<i64: 1, 64>}, {transform_indices = @transform_3, window_bounds = array<i64: 16, 64>}]} {
    %c0 = arith.constant 0 : index
    %c0_0 = arith.constant 0 : index
    %0 = vector.load %arg1[%c0, %c0_0] : memref<16x32xbf16, #tpu.memory_space<vmem>>, vector<16x32xbf16>
    %c0_1 = arith.constant 0 : index
    %c0_2 = arith.constant 0 : index
    %1 = vector.load %arg2[%c0_1, %c0_2] : memref<32x64xbf16, #tpu.memory_space<vmem>>, vector<32x64xbf16>
    %cst = arith.constant dense<0.000000e+00> : vector<16x64xf32>
    %2 = tpu.matmul %0, %1, %cst {dimension_numbers = #tpu.dot_dimension_numbers<[1], [0], [0], [1], [0, 0, 1, 1], [], []>} : vector<16x32xbf16>, vector<32x64xbf16>, vector<16x64xf32> -> vector<16x64xf32>
    %c0_3 = arith.constant 0 : index
    %c0_4 = arith.constant 0 : index
    %3 = vector.load %arg3[%c0_3, %c0_4] : memref<1x64xf32, #tpu.memory_space<vmem>>, vector<1x64xf32>
    %4 = vector.broadcast %3 : vector<1x64xf32> to vector<16x64xf32>
    %5 = arith.addf %2, %4 : vector<16x64xf32>
    %cst_5 = arith.constant 5.000000e-01 : f32
    %6 = vector.broadcast %cst_5 : f32 to vector<16x64xf32>
    %7 = arith.mulf %6, %5 : vector<16x64xf32>
    %cst_6 = arith.constant 0.707106769 : f32
    %8 = vector.broadcast %cst_6 : f32 to vector<16x64xf32>
    %9 = arith.mulf %5, %8 : vector<16x64xf32>
    %10 = math.erf %9 : vector<16x64xf32>
    %cst_7 = arith.constant 1.000000e+00 : f32
    %11 = vector.broadcast %cst_7 : f32 to vector<16x64xf32>
    %12 = arith.addf %11, %10 : vector<16x64xf32>
    %13 = arith.mulf %7, %12 : vector<16x64xf32>
    %14 = arith.truncf %13 : vector<16x64xf32> to vector<16x64xbf16>
    %c0_8 = arith.constant 0 : index
    %c0_9 = arith.constant 0 : index
    %15 = vector.load %arg4[%c0_8, %c0_9] : memref<16x64xbf16, #tpu.memory_space<vmem>>, vector<16x64xbf16>
    tpu.vector_store %arg4[%c0_8, %c0_9], %14 {strides = array<i32>} : memref<16x64xbf16, #tpu.memory_space<vmem>>, vector<16x64xbf16>,
    return
  }
  func.func @transform_0(%arg0: i32) -> (i32, i32) {
    %c0_i32 = arith.constant 0 : i32
    %c0_i32_0 = arith.constant 0 : i32
    return %arg0, %c0_i32 : i32, i32
  }
  func.func @transform_1(%arg0: i32) -> (i32, i32) {
    %c0_i32 = arith.constant 0 : i32
    %c0_i32_0 = arith.constant 0 : i32
    %c0_i32_1 = arith.constant 0 : i32
    return %c0_i32, %c0_i32_0 : i32, i32
  }
  func.func @transform_2(%arg0: i32) -> (i32, i32) {
    %c0_i32 = arith.constant 0 : i32
    %c0_i32_0 = arith.constant 0 : i32
    %c0_i32_1 = arith.constant 0 : i32
    return %c0_i32, %c0_i32_0 : i32, i32
  }
  func.func @transform_3(%arg0: i32) -> (i32, i32) {
    %c0_i32 = arith.constant 0 : i32
    %c0_i32_0 = arith.constant 0 : i32
    return %arg0, %c0_i32 : i32, i32
  }
}

module attributes {stable_mosaic.version = 11 : i64} {
  func.func @_dense_resident_kernel(%arg0: i32, %arg1: memref<16x64xbf16, #tpu.memory_space<vmem>>, %arg2: memref<64x32xbf16, #tpu.memory_space<vmem>>, %arg3: memref<1x32xf32, #tpu.memory_space<vmem>>, %arg4: memref<16x32xbf16, #tpu.memory_space<vmem>>, %arg5: memref<1x32xf32, #tpu.memory_space<vmem>>, %arg6: memref<1x32xf32, #tpu.memory_space<vmem>>, %arg7: memref<16x32xbf16, #tpu.memory_space<vmem>>) attributes {dimension_semantics = [#tpu.dimension_semantics<parallel>], iteration_bounds = array<i64: 1>, scalar_prefetch = 0 : i64, scratch_operands = 0 : i64, tpu.core_type = #tpu.core_type<tc>, window_params = [{transform_indices = @transform_0, window_bounds = array<i64: 16, 64>}, {pipeline_mode = #tpu.pipeline_mode<synchronous>, transform_indices = @transform_1, window_bounds = array<i64: 64, 32>}, {pipeline_mode = #tpu.pipeline_mode<synchronous>, transform_indices = @transform_2, window_bounds = array<i64: 1, 32>}, {transform_indices = @transform_3, window_bounds = array<i64: 16, 32>}, {pipeline_mode = #tpu.pipeline_mode<synchronous>, transform_indices = @transform_4, window_bounds = array<i64: 1, 32>}, {pipeline_mode = #tpu.pipeline_mode<synchronous>, transform_indices = @transform_5, window_bounds = array<i64: 1, 32>}, {transform_indices = @transform_6, window_bounds = array<i64: 16, 32>}]} {
    %c0 = arith.constant 0 : index
    %c0_0 = arith.constant 0 : index
    %0 = vector.load %arg1[%c0, %c0_0] : memref<16x64xbf16, #tpu.memory_space<vmem>>, vector<16x64xbf16>
    %c0_1 = arith.constant 0 : index
    %c0_2 = arith.constant 0 : index
    %1 = vector.load %arg2[%c0_1, %c0_2] : memref<64x32xbf16, #tpu.memory_space<vmem>>, vector<64x32xbf16>
    %cst = arith.constant dense<0.000000e+00> : vector<16x32xf32>
    %2 = tpu.matmul %0, %1, %cst {dimension_numbers = #tpu.dot_dimension_numbers<[1], [0], [0], [1], [0, 0, 1, 1], [], []>} : vector<16x64xbf16>, vector<64x32xbf16>, vector<16x32xf32> -> vector<16x32xf32>
    %c0_3 = arith.constant 0 : index
    %c0_4 = arith.constant 0 : index
    %3 = vector.load %arg3[%c0_3, %c0_4] : memref<1x32xf32, #tpu.memory_space<vmem>>, vector<1x32xf32>
    %4 = vector.broadcast %3 : vector<1x32xf32> to vector<16x32xf32>
    %5 = arith.addf %2, %4 : vector<16x32xf32>
    %c0_5 = arith.constant 0 : index
    %c0_6 = arith.constant 0 : index
    %6 = vector.load %arg4[%c0_5, %c0_6] : memref<16x32xbf16, #tpu.memory_space<vmem>>, vector<16x32xbf16>
    %7 = arith.extf %6 : vector<16x32xbf16> to vector<16x32xf32>
    %8 = arith.addf %5, %7 : vector<16x32xf32>
    %cst_7 = arith.constant dense<0.000000e+00> : vector<16xf32>
    %9 = vector.multi_reduction <add>, %8, %cst_7 [1] : vector<16x32xf32> to vector<16xf32>
    %10 = vector.shape_cast %9 : vector<16xf32> to vector<16x1xf32>
    %cst_8 = arith.constant 3.200000e+01 : f32
    %11 = vector.broadcast %cst_8 : f32 to vector<16x1xf32>
    %12 = arith.divf %10, %11 : vector<16x1xf32>
    %13 = vector.broadcast %12 : vector<16x1xf32> to vector<16x32xf32>
    %14 = arith.subf %8, %13 : vector<16x32xf32>
    %15 = arith.mulf %14, %14 : vector<16x32xf32>
    %cst_9 = arith.constant dense<0.000000e+00> : vector<16xf32>
    %16 = vector.multi_reduction <add>, %15, %cst_9 [1] : vector<16x32xf32> to vector<16xf32>
    %17 = vector.shape_cast %16 : vector<16xf32> to vector<16x1xf32>
    %cst_10 = arith.constant 3.200000e+01 : f32
    %18 = vector.broadcast %cst_10 : f32 to vector<16x1xf32>
    %19 = arith.divf %17, %18 : vector<16x1xf32>
    %20 = vector.broadcast %12 : vector<16x1xf32> to vector<16x32xf32>
    %21 = arith.subf %8, %20 : vector<16x32xf32>
    %cst_11 = arith.constant 9.99999996E-13 : f32
    %22 = vector.broadcast %cst_11 : f32 to vector<16x1xf32>
    %23 = arith.addf %19, %22 : vector<16x1xf32>
    %24 = math.rsqrt %23 : vector<16x1xf32>
    %25 = vector.broadcast %24 : vector<16x1xf32> to vector<16x32xf32>
    %26 = arith.mulf %21, %25 : vector<16x32xf32>
    %c0_12 = arith.constant 0 : index
    %c0_13 = arith.constant 0 : index
    %27 = vector.load %arg5[%c0_12, %c0_13] : memref<1x32xf32, #tpu.memory_space<vmem>>, vector<1x32xf32>
    %28 = vector.broadcast %27 : vector<1x32xf32> to vector<16x32xf32>
    %29 = arith.mulf %26, %28 : vector<16x32xf32>
    %c0_14 = arith.constant 0 : index
    %c0_15 = arith.constant 0 : index
    %30 = vector.load %arg6[%c0_14, %c0_15] : memref<1x32xf32, #tpu.memory_space<vmem>>, vector<1x32xf32>
    %31 = vector.broadcast %30 : vector<1x32xf32> to vector<16x32xf32>
    %32 = arith.addf %29, %31 : vector<16x32xf32>
    %33 = arith.truncf %32 : vector<16x32xf32> to vector<16x32xbf16>
    %c0_16 = arith.constant 0 : index
    %c0_17 = arith.constant 0 : index
    %34 = vector.load %arg7[%c0_16, %c0_17] : memref<16x32xbf16, #tpu.memory_space<vmem>>, vector<16x32xbf16>
    tpu.vector_store %arg7[%c0_16, %c0_17], %33 {strides = array<i32>} : memref<16x32xbf16, #tpu.memory_space<vmem>>, vector<16x32xbf16>,
    return
  }
  func.func @transform_0(%arg0: i32) -> (i32, i32) {
    %c0_i32 = arith.constant 0 : i32
    %c0_i32_0 = arith.constant 0 : i32
    return %arg0, %c0_i32 : i32, i32
  }
  func.func @transform_1(%arg0: i32) -> (i32, i32) {
    %c0_i32 = arith.constant 0 : i32
    %c0_i32_0 = arith.constant 0 : i32
    %c0_i32_1 = arith.constant 0 : i32
    return %c0_i32, %c0_i32_0 : i32, i32
  }
  func.func @transform_2(%arg0: i32) -> (i32, i32) {
    %c0_i32 = arith.constant 0 : i32
    %c0_i32_0 = arith.constant 0 : i32
    %c0_i32_1 = arith.constant 0 : i32
    return %c0_i32, %c0_i32_0 : i32, i32
  }
  func.func @transform_3(%arg0: i32) -> (i32, i32) {
    %c0_i32 = arith.constant 0 : i32
    %c0_i32_0 = arith.constant 0 : i32
    return %arg0, %c0_i32 : i32, i32
  }
  func.func @transform_4(%arg0: i32) -> (i32, i32) {
    %c0_i32 = arith.constant 0 : i32
    %c0_i32_0 = arith.constant 0 : i32
    %c0_i32_1 = arith.constant 0 : i32
    return %c0_i32, %c0_i32_0 : i32, i32
  }
  func.func @transform_5(%arg0: i32) -> (i32, i32) {
    %c0_i32 = arith.constant 0 : i32
    %c0_i32_0 = arith.constant 0 : i32
    %c0_i32_1 = arith.constant 0 : i32
    return %c0_i32, %c0_i32_0 : i32, i32
  }
  func.func @transform_6(%arg0: i32) -> (i32, i32) {
    %c0_i32 = arith.constant 0 : i32
    %c0_i32_0 = arith.constant 0 : i32
    return %arg0, %c0_i32 : i32, i32
  }
}

module attributes {stable_mosaic.version = 11 : i64} {
  func.func @_dense_resident_kernel(%arg0: i32, %arg1: memref<2x32xbf16, #tpu.memory_space<vmem>>, %arg2: memref<32x32xbf16, #tpu.memory_space<vmem>>, %arg3: memref<1x32xf32, #tpu.memory_space<vmem>>, %arg4: memref<2x32xf32, #tpu.memory_space<vmem>>) attributes {dimension_semantics = [#tpu.dimension_semantics<parallel>], iteration_bounds = array<i64: 1>, scalar_prefetch = 0 : i64, scratch_operands = 0 : i64, tpu.core_type = #tpu.core_type<tc>, window_params = [{transform_indices = @transform_0, window_bounds = array<i64: 2, 32>}, {pipeline_mode = #tpu.pipeline_mode<synchronous>, transform_indices = @transform_1, window_bounds = array<i64: 32, 32>}, {pipeline_mode = #tpu.pipeline_mode<synchronous>, transform_indices = @transform_2, window_bounds = array<i64: 1, 32>}, {transform_indices = @transform_3, window_bounds = array<i64: 2, 32>}]} {
    %c0 = arith.constant 0 : index
    %c0_0 = arith.constant 0 : index
    %0 = vector.load %arg1[%c0, %c0_0] : memref<2x32xbf16, #tpu.memory_space<vmem>>, vector<2x32xbf16>
    %c0_1 = arith.constant 0 : index
    %c0_2 = arith.constant 0 : index
    %1 = vector.load %arg2[%c0_1, %c0_2] : memref<32x32xbf16, #tpu.memory_space<vmem>>, vector<32x32xbf16>
    %cst = arith.constant dense<0.000000e+00> : vector<2x32xf32>
    %2 = tpu.matmul %0, %1, %cst {dimension_numbers = #tpu.dot_dimension_numbers<[1], [0], [0], [1], [0, 0, 1, 1], [], []>} : vector<2x32xbf16>, vector<32x32xbf16>, vector<2x32xf32> -> vector<2x32xf32>
    %c0_3 = arith.constant 0 : index
    %c0_4 = arith.constant 0 : index
    %3 = vector.load %arg3[%c0_3, %c0_4] : memref<1x32xf32, #tpu.memory_space<vmem>>, vector<1x32xf32>
    %4 = vector.broadcast %3 : vector<1x32xf32> to vector<2x32xf32>
    %5 = arith.addf %2, %4 : vector<2x32xf32>
    %6 = math.tanh %5 : vector<2x32xf32>
    %c0_5 = arith.constant 0 : index
    %c0_6 = arith.constant 0 : index
    %7 = vector.load %arg4[%c0_5, %c0_6] : memref<2x32xf32, #tpu.memory_space<vmem>>, vector<2x32xf32>
    tpu.vector_store %arg4[%c0_5, %c0_6], %6 {strides = array<i32>} : memref<2x32xf32, #tpu.memory_space<vmem>>, vector<2x32xf32>,
    return
  }
  func.func @transform_0(%arg0: i32) -> (i32, i32) {
    %c0_i32 = arith.constant 0 : i32
    %c0_i32_0 = arith.constant 0 : i32
    return %arg0, %c0_i32 : i32, i32
  }
  func.func @transform_1(%arg0: i32) -> (i32, i32) {
    %c0_i32 = arith.constant 0 : i32
    %c0_i32_0 = arith.constant 0 : i32
    %c0_i32_1 = arith.constant 0 : i32
    return %c0_i32, %c0_i32_0 : i32, i32
  }
  func.func @transform_2(%arg0: i32) -> (i32, i32) {
    %c0_i32 = arith.constant 0 : i32
    %c0_i32_0 = arith.constant 0 : i32
    %c0_i32_1 = arith.constant 0 : i32
    return %c0_i32, %c0_i32_0 : i32, i32
  }
  func.func @transform_3(%arg0: i32) -> (i32, i32) {
    %c0_i32 = arith.constant 0 : i32
    %c0_i32_0 = arith.constant 0 : i32
    return %arg0, %c0_i32 : i32, i32
  }
}

</mosaic_0001>

<bundles_post_ra>
// kernel: bert_encoder_forward.13
= control target key start
LH: loop header
LB: loop body
LE: loop exit
PB: predicated region body
PF: predicated region fallthrough
CT: control target
= control target key end

     0   :  { %v130_v0 = vmov 0.0   ;;  %vm131_vm0 = vmmov 0   ;;  %vm45_vm1 = vcmask 261120   ;;  %vm98_vm2 = vcmask 781312   ;;  %s170_s1 = inlined_call_operand.vmem [shape: bf16[32,96], index: 1, kind: input, shape index: {}]   ;;  %s171_s0 = inlined_call_operand.vmem [shape: bf16[16,32], index: 0, kind: input, shape index: {}]   ;;  %s172_s2 = inlined_call_operand.vmem [shape: f32[1,96], index: 2, kind: input, shape index: {}]   ;;  %s173_s3 = inlined_call_operand.vmem [shape: bf16[16,96], index: 3, kind: output, shape index: {}]  }
   0x1   :  { %117 = vmatprep.subr.bf16.mxu0 %v130_v0  ;;  %v127_v1 = vld [vmem:[%s170_s1] sm:$0xff]   ;;  %121 = vmatprep.mubr.msk.bf16.mxu0 %vm131_vm0, %v130_v0  ;;  %v128_v2 = vld [vmem:[%s170_s1 + $0x8] sm:$0xff]  }
   0x2   :  { %118 = vmatpush3.bf16.msra.mxu0 %v127_v1  ;;  %v129_v3 = vld [vmem:[%s171_s0] sm:$0xff]  }
   0x3   :  { %119 = vmatprep.subr.bf16.mxu0 %v130_v0  ;;  %v105_v4 = vld [vmem:[%s172_s2] ss:$0 sm:$0xff] }
   0x6   :  { %120 = vmatpush3.bf16.msra.mxu0 %v128_v2 }
   0x9   :  { %122 = vmatmul.mubr.msk.bf16.vlgmr.msra.gmra.mrb[0].mxu0 %vm45_vm1, %v129_v3 }
  0xdc   :  { %v83_v5 = vpop.f32.mrb[0].mxu0 }
  0xdd   :  { %v84_v6 = vadd.f32 %v105_v4, %v83_v5  ;;  %v123_v7 = vpop.f32.mrb[1].mxu0 }
  0xde   :  { %v86_v8 = vpop.f32.mrb[2].mxu0 }
  0xdf   :  { %v112_v9 = vpack.c.bf16 %v84_v6, %v84_v6  ;;  %v87_v10 = vadd.f32 %v105_v4, %v86_v8  ;;  %v124_v11 = vpop.f32.mrb[3].mxu0 }
  0xe1   :  { %99 = vst.msk [vmem:[%s173_s3] sm:$0xf] %vm98_vm2, %v112_v9  ;;  %v113_v12 = vpack.c.bf16 %v87_v10, %v87_v10 }
  0xe3   :  { %100 = vst.msk [vmem:[%s173_s3 + $0x4] sm:$0xf] %vm98_vm2, %v113_v12 }

// kernel: bert_encoder_forward.15
= control target key start
LH: loop header
LB: loop body
LE: loop exit
PB: predicated region body
PF: predicated region fallthrough
CT: control target
= control target key end

     0   :  { %v200_v0 = vmov 0.0   ;;  %vm201_vm0 = vmmov 0   ;;  %vm54_vm1 = vcmask 261120   ;;  %vm158_vm2 = vcmask 257024   ;;  %s269_s1 = inlined_call_operand.vmem [shape: bf16[32,32], index: 1, kind: input, shape index: {}]   ;;  %s270_s0 = inlined_call_operand.vmem [shape: bf16[16,32], index: 0, kind: input, shape index: {}]   ;;  %s271_s3 = inlined_call_operand.vmem [shape: bf16[16,32], index: 3, kind: input, shape index: {}]   ;;  %s272_s2 = inlined_call_operand.vmem [shape: f32[1,32], index: 2, kind: input, shape index: {}]   ;;  %s273_s4 = inlined_call_operand.vmem [shape: f32[1,32], index: 4, kind: input, shape index: {}]   ;;  %s274_s5 = inlined_call_operand.vmem [shape: f32[1,32], index: 5, kind: input, shape index: {}]   ;;  %s275_s6 = inlined_call_operand.vmem [shape: bf16[16,32], index: 6, kind: output, shape index: {}]  }
   0x1   :  { %183 = vmatprep.subr.bf16.mxu0 %v200_v0  ;;  %v193_v1 = vld [vmem:[%s269_s1] sm:$0xff]   ;;  %187 = vmatprep.mubr.msk.bf16.mxu0 %vm201_vm0, %v200_v0  ;;  %v194_v2 = vld [vmem:[%s269_s1 + $0x8] sm:$0xff]  }
   0x2   :  { %184 = vmatpush3.bf16.msra.mxu0 %v193_v1  ;;  %v195_v3 = vld [vmem:[%s270_s0] sm:$0xff]  }
   0x3   :  { %185 = vmatprep.subr.bf16.mxu0 %v200_v0  ;;  %v177_v4 = vld [vmem:[%s271_s3] sm:$0xff]  }
   0x4   :  { %v165_v5 = vld [vmem:[%s272_s2] ss:$0 sm:$0xff]  ;;  %v178_v6 = vunpack.c.l.bf16 %v177_v4  ;;  %v179_v10 = vunpack.c.h.bf16 %v177_v4 }
   0x5   :  { %v170_v35 = vld [vmem:[%s273_s4] ss:$0 sm:$0xff] }
   0x6   :  { %186 = vmatpush3.bf16.msra.mxu0 %v194_v2  ;;  %v171_v37 = vld [vmem:[%s274_s5] ss:$0 sm:$0xff] }
   0x9   :  { %188 = vmatmul.mubr.msk.bf16.vlgmr.msra.gmra.mrb[0].mxu0 %vm54_vm1, %v195_v3 }
  0xdc   :  { %v92_v7 = vpop.f32.mrb[0].mxu0 }
  0xdd   :  { %v93_v8 = vadd.f32 %v165_v5, %v92_v7  ;;  %v189_v9 = vpop.f32.mrb[1].mxu0 }
  0xde   :  { %v95_v11 = vpop.f32.mrb[2].mxu0 }
  0xdf   :  { %v96_v12 = vadd.f32 %v165_v5, %v95_v11  ;;  %v190_v13 = vpop.f32.mrb[3].mxu0  ;;  %v103_v14 = vadd.f32 %v178_v6, %v93_v8 }
  0xe1   :  { %v105_v15 = vsel %vm54_vm1, %v103_v14, 0.0  ;;  %v104_v16 = vadd.f32 %v179_v10, %v96_v12 }
  0xe2   :  { %106 = vadd.xlane.f32.xlu0 %v105_v15 }
  0xe3   :  { %v108_v17 = vsel %vm54_vm1, %v104_v16, 0.0 }
  0xe6   :  { %109 = vadd.xlane.f32.xlu0 %v108_v17 }
 0x16f   :  { %v107_v18 = vpop.xlane.xlu0 %106 }
 0x170   :  { %v112_v19 = vmul.f32 0.03125, %v107_v18 }
 0x172   :  { %v114_v20 = vsub.f32 %v103_v14, %v112_v19 }
 0x173   :  { %v110_v21 = vpop.xlane.xlu0 %109 }
 0x174   :  { %v113_v22 = vmul.f32 0.03125, %v110_v21  ;;  %v116_v23 = vmul.f32 %v114_v20, %v114_v20 }
 0x176   :  { %v115_v24 = vsub.f32 %v104_v16, %v113_v22  ;;  %v118_v25 = vsel %vm54_vm1, %v116_v23, 0.0 }
 0x177   :  { %119 = vadd.xlane.f32.xlu1 %v118_v25 }
 0x178   :  { %v117_v26 = vmul.f32 %v115_v24, %v115_v24 }
 0x17a   :  { %v121_v27 = vsel %vm54_vm1, %v117_v26, 0.0 }
 0x17b   :  { %122 = vadd.xlane.f32.xlu1 %v121_v27 }
 0x204   :  { %v120_v28 = vpop.xlane.xlu1 %119 }
 0x205   :  { %v124_v29 = vmul.f32 0.03125, %v120_v28 }
 0x207   :  { %v126_v30 = vadd.f32 1e-12, %v124_v29 }
 0x208   :  { %v123_v31 = vpop.xlane.xlu1 %122 }
 0x209   :  { %196 = vrsqrt.f32 %v126_v30  ;;  %v125_v32 = vmul.f32 0.03125, %v123_v31 }
 0x20b   :  { %v127_v33 = vadd.f32 1e-12, %v125_v32 }
 0x20d   :  { %198 = vrsqrt.f32 %v127_v33 }
 0x213   :  { %v197_v34 = vpop.eup %196 }
 0x214   :  { %v130_v36 = vmul.f32 %v197_v34, %v114_v20 }
 0x216   :  { %v139_v38 = vmul.f32 %v170_v35, %v130_v36 }
 0x217   :  { %v199_v39 = vpop.eup %198 }
 0x218   :  { %v148_v40 = vadd.f32 %v171_v37, %v139_v38  ;;  %v131_v41 = vmul.f32 %v199_v39, %v115_v24 }
 0x21a   :  { %v174_v42 = vpack.c.bf16 %v148_v40, %v148_v40  ;;  %v140_v43 = vmul.f32 %v170_v35, %v131_v41 }
 0x21c   :  { %159 = vst.msk [vmem:[%s275_s6] sm:$0xf] %vm158_vm2, %v174_v42  ;;  %v149_v44 = vadd.f32 %v171_v37, %v140_v43 }
 0x21e   :  { %v175_v45 = vpack.c.bf16 %v149_v44, %v149_v44 }
 0x220   :  { %160 = vst.msk [vmem:[%s275_s6 + $0x4] sm:$0xf] %vm158_vm2, %v175_v45 }

// kernel: bert_encoder_forward.12
= control target key start
LH: loop header
LB: loop body
LE: loop exit
PB: predicated region body
PF: predicated region fallthrough
CT: control target
= control target key end

     0   :  { %s455_s15 = smov 0   ;;  %s457_s16 = smov 0   ;;  %s497_s0 = inlined_call_operand.vmem [shape: f32[2,8,32], index: 0, kind: input, shape index: {}]   ;;  %s498_s1 = inlined_call_operand.vmem [shape: f32[8,32], index: 1, kind: input, shape index: {}]   ;;  %s499_s2 = inlined_call_operand.vmem [shape: f32[1,32], index: 2, kind: input, shape index: {}]   ;;  %s500_s3 = inlined_call_operand.vmem [shape: f32[1,32], index: 3, kind: input, shape index: {}]   ;;  %s501_s4 = inlined_call_operand.vmem [shape: bf16[2,8,32], index: 4, kind: output, shape index: {}]  }
   0x1   :  { %s459_s17 = smov 0  }
   0x2 LB: > { %s26_s18 = sadd.s32 1, %s424_s16  ;;  %p373_p0 = scmp.ge.s32.totalorder %s428_s17, 1  ;;  %s428_s17 = sphi %s459_s17, %s14_s17   ;;  %s424_s16 = sphi %s457_s16, %s503_s16   ;;  %s420_s15 = sphi %s455_s15, %s502_s15  }
   0x3   : > { %p28_p1 = scmp.ge.s32.totalorder %s26_s18, 2  ;;  %p189_p2 = scmp.lt.s32.totalorder %s428_s17, 3 }
   0x5   : > { %s505_s18 = smov (%p28_p1, %s26_s18), 0  ;;  %p190_p3 = pnand %p373_p0, %p189_p2 }
   0x6   : > { %p223_p4 = scmp.lt.s32.totalorder (!%p190_p3), %s420_s15, 1  ;;  %v242_v0 = vld [vmem:[%s498_s1] sm:$0xff] (!%p190_p3)  ;;  %vm244_vm0 = vcmask (!%p190_p3), 261120   ;;  %vm276_vm1 = vcmask (!%p190_p3), 257024  }
   0x7   : > { %193 = sbr.rel (%p190_p3) target bundleno = 336 (0x150), region = 36  ;;  %v376_v13 = vld [vmem:[%s499_s2] ss:$0 sm:$0xff] (!%p190_p3) }
   0x8   : > { %v377_v15 = vld [vmem:[%s500_s3] ss:$0 sm:$0xff] (!%p190_p3) }
   0xe   : > { %s507_s15 = smov (!%p223_p4, %s420_s15), 1 }
   0xf   : > { %s374_s19 = sshll.u32 %s507_s15, 3  ;;  %s375_s29 = sshll.u32 %s507_s15, 2 }
  0x10   : > { %s229_s24 = scalar_lea.vmem %s497_s0, %s374_s19  ;;  %s240_s6 = scalar_lea.vmem %s501_s4, %s375_s29 }
  0x11   : > { %v241_v1 = vld [vmem:[%s229_s24] sm:$0xff] }
  0x12   : > { %v243_v2 = vadd.f32 %v242_v0, %v241_v1 }
  0x14   : > { %v245_v3 = vsel %vm244_vm0, %v243_v2, 0.0 }
  0x15   : > { %246 = vadd.xlane.f32.xlu0 %v245_v3 }
  0xa2   : > { %v247_v4 = vpop.xlane.xlu0 %246 }
  0xa3   : > { %v249_v5 = vmul.f32 0.03125, %v247_v4 }
  0xa5   : > { %v250_v6 = vsub.f32 %v243_v2, %v249_v5 }
  0xa7   : > { %v251_v7 = vmul.f32 %v250_v6, %v250_v6 }
  0xa9   : > { %v252_v8 = vsel %vm244_vm0, %v251_v7, 0.0 }
  0xaa   : > { %253 = vadd.xlane.f32.xlu0 %v252_v8 }
 0x137   : > { %v254_v9 = vpop.xlane.xlu0 %253 }
 0x138   : > { %v255_v10 = vmul.f32 0.03125, %v254_v9 }
 0x13a   : > { %v256_v11 = vadd.f32 1e-12, %v255_v10 }
 0x13c   : > { %404 = vrsqrt.f32 %v256_v11 }
 0x146   : > { %v405_v12 = vpop.eup %404 }
 0x147   : > { %v258_v14 = vmul.f32 %v405_v12, %v250_v6 }
 0x149   : > { %v266_v16 = vmul.f32 %v376_v13, %v258_v14 }
 0x14b   : > { %v274_v17 = vadd.f32 %v377_v15, %v266_v16 }
 0x14d   : > { %v275_v18 = vpack.c.bf16 %v274_v17, %v274_v17 }
 0x14f   : > { %277 = vst.msk [vmem:[%s240_s6] sm:$0xf] %vm276_vm1, %v275_v18 }
 0x150 PF: > { %s14_s17 = sadd.s32 1, %s428_s17   ;;  %s502_s15 = smov %s424_s16 }
 0x151   : > { %p11_p5 = scmp.ge.s32.totalorder %s14_s17, 4   ;;  %s503_s16 = smov %s505_s18 }
 0x153   :  { %13 = sbr.rel (!%p11_p5) target bundleno = 2 (0x2), region = 69 }

// kernel: bert_encoder_forward.14
= control target key start
LH: loop header
LB: loop body
LE: loop exit
PB: predicated region body
PF: predicated region fallthrough
CT: control target
= control target key end

     0   :  { %s594_s6 = smov 0   ;;  %s596_s7 = smov 0   ;;  %s660_s0 = inlined_call_operand.vmem [shape: bf16[2,8,96], index: 0, kind: input, shape index: {}]   ;;  %s661_s1 = inlined_call_operand.vmem [shape: bf16[2,8,32], index: 1, kind: output, shape index: {}]  }
   0x1   :  { %s598_s8 = smov 0  }
   0x2 LB: > { %s23_s9 = sadd.s32 1, %s570_s7  ;;  %p463_p0 = scmp.ge.s32.totalorder %s574_s8, 1  ;;  %s574_s8 = sphi %s598_s8, %s11_s8   ;;  %s570_s7 = sphi %s596_s7, %s663_s7   ;;  %s566_s6 = sphi %s594_s6, %s662_s6  }
   0x3   : > { %p25_p1 = scmp.ge.s32.totalorder %s23_s9, 2  ;;  %p100_p2 = scmp.lt.s32.totalorder %s574_s8, 3 }
   0x5   : > { %s665_s9 = smov (%p25_p1, %s23_s9), 0  ;;  %p101_p3 = pnand %p463_p0, %p100_p2 }
   0x6   : > { %p121_p4 = scmp.lt.s32.totalorder (!%p101_p3), %s566_s6, 1  ;;  %v576_v0 = vmov (!%p101_p3), 0.0   ;;  %vm577_vm0 = vmmov (!%p101_p3), 0   ;;  %s578_s14 = smov (!%p101_p3), 96   ;;  %vm145_vm1 = vcmask (!%p101_p3), 130048   ;;  %vm193_vm2 = vcmask (!%p101_p3), 64512  }
   0x7   : > { %104 = sbr.rel (%p101_p3) target bundleno = 1539 (0x603), region = 24  ;;  %485 = vmatprep.subr.bf16.mxu0 (!%p101_p3), %v576_v0  ;;  %487 = vmatprep.mubr.msk.bf16.mxu0 (!%p101_p3), %vm577_vm0, %v576_v0  ;;  %s579_s15 = smov (!%p101_p3), 64   ;;  %vm211_vm3 = vcmask (!%p101_p3), 1043456   ;;  %vm256_vm4 = vcmask (!%p101_p3), 125952   ;;  %vm384_vm5 = vcmask (!%p101_p3), 257152  }
   0x8   : > { %491 = vmatprep.subr.bf16.mxu1 (!%p101_p3), %v576_v0  ;;  %493 = vmatprep.mubr.msk.bf16.mxu1 (!%p101_p3), %vm577_vm0, %v576_v0  ;;  %s580_s16 = smov (!%p101_p3), 80   ;;  %s581_s17 = smov (!%p101_p3), 112  }
   0x9   : > { %s582_s21 = smov (!%p101_p3), 48   ;;  %s583_s22 = smov (!%p101_p3), 16  }
   0xe   : > { %s667_s6 = smov (!%p121_p4, %s566_s6), 1 }
   0xf   : > { %s464_s10 = sshll.u32 %s667_s6, 2 }
  0x10   : > { %s622_s13 = scalar_lea.vmem %s660_s0, %s464_s10  ;;  %s643_s20 = scalar_lea.vmem %s661_s1, %s464_s10 }
  0x11   : > { %v541_v1 = vld [vmem:[%s622_s13] ss:$0 sps:$4 sm:$0xff]  }
  0x12   : > { %143 = vrot.lane.b32.xlu0 %v541_v1, %s578_s14  ;;  %v138_v4 = vld [vmem:[%s622_s13] sm:$0xf]  ;;  %206 = vrot.lane.b32.xlu1 %v541_v1, %s579_s15 }
  0x13   : > { %v542_v18 = vld [vmem:[%s622_s13] ss:$0 sps:$4 sm:$0xff]  }
  0x14   : > { %v543_v19 = vld [vmem:[%s622_s13] ss:$0 sps:$4 sm:$0xff]  }
  0x84   : > { %v144_v2 = vpop.permute.xlu0 %143  ;;  %v207_v11 = vpop.permute.xlu1 %206 }
  0x85   : > { %v150_v3 = vsel %vm145_vm1, %v144_v2, 0  ;;  %v213_v12 = vsel %vm211_vm3, %v207_v11, 0 }
  0x86   : > { %486 = vmatpush3.bf16.xpose.msra.mxu0 %v150_v3  ;;  %492 = vmatpush3.bf16.msra.mxu1 %v213_v12 }
  0x87   : > { %503 = vmatprep.subr.bf16.mxu0 %v576_v0  ;;  %497 = vmatprep.subr.bf16.mxu1 %v576_v0 }
  0x8d   : > { %488 = vmatmul.mubr.msk.bf16.vlgmr.msra.gmra.mrb[0].mxu0 %vm145_vm1, %v138_v4 }
  0x8e   : > { %505 = vmatprep.mubr.msk.bf16.mxu0 %vm577_vm0, %v576_v0 }
 0x160   : > { %v186_v5 = vpop.f32.mrb[0].mxu0 }
 0x161   : > { %v192_v6 = vmul.f32 0.25, %v186_v5  ;;  %v489_v7 = vpop.f32.mrb[1].mxu0 }
 0x162   : > { %v189_v8 = vpop.f32.mrb[2].mxu0 }
 0x163   : > { %v490_v9 = vpop.f32.mrb[3].mxu0  ;;  %v194_v10 = vsel %vm193_vm2, %v192_v6, -inf }
 0x164   : > { %195 = vmax.xlane.f32.xlu0 %v194_v10 }
 0x1f1   : > { %v196_v13 = vpop.xlane.xlu0 %195 }
 0x1f2   : > { %v197_v14 = vsub.f32 %v192_v6, %v196_v13 }
 0x1f4   : > { %v198_v15 = vmul.f32 1.442695, %v197_v14 }
 0x1f6   : > { %544 = vpow2.f32 %v198_v15 }
 0x200   : > { %v545_v16 = vpop.eup %544 }
 0x201   : > { %v200_v17 = vsel %vm193_vm2, %v545_v16, 0.0 }
 0x202   : > { %201 = vadd.xlane.f32.xlu1 %v200_v17 }
 0x213   : > { %268 = vrot.lane.b32.xlu1 %v542_v18, %s580_s16 }
 0x217   : > { %263 = vrot.lane.b32.xlu1 %v543_v19, %s581_s17 }
 0x28f   : > { %v202_v20 = vpop.xlane.xlu1 %201 }
 0x290   : > { %546 = vrcp.f32 %v202_v20 }
 0x293   : > { %v269_v22 = vpop.permute.xlu1 %268 }
 0x294   : > { %v274_v24 = vsel %vm145_vm1, %v269_v22, 0 }
 0x297   : > { %v264_v26 = vpop.permute.xlu1 %263 }
 0x29a   : > { %v547_v21 = vpop.eup %546 }
 0x29b   : > { %v204_v23 = vmul.f32 %v547_v21, %v545_v16 }
 0x29d   : > { %v205_v25 = vpack.c.bf16 %v204_v23, %v204_v23 }
 0x29f   : > { %494 = vmatmul.mubr.msk.bf16.vlgmr.msra.gmra.mrb[0].mxu1 %vm193_vm2, %v205_v25 }
 0x2a0   : > { %498 = vmatpush3.bf16.xpose.msra.mxu1 %v274_v24  ;;  %499 = vmatprep.mubr.msk.bf16.mxu1 %vm577_vm0, %v576_v0 }
 0x2a7   : > { %500 = vmatmul.mubr.msk.bf16.vlgmr.msra.gmra.mrb[4].mxu1 %vm145_vm1, %v264_v26 }
 0x372   : > { %v249_v27 = vpop.f32.mrb[0].mxu1 }
 0x373   : > { %v255_v28 = vpack.c.bf16 %v249_v27, %v249_v27  ;;  %v495_v29 = vpop.f32.mrb[1].mxu1 }
 0x374   : > { %v252_v30 = vpop.f32.mrb[2].mxu1 }
 0x375   : > { %257 = vst.msk [vmem:[%s643_s20] sm:$0xf] %vm256_vm4, %v255_v28  ;;  %v496_v31 = vpop.f32.mrb[3].mxu1 }
 0x37a   : > { %v310_v32 = vpop.f32.mrb[4].mxu1 }
 0x37b   : > { %v316_v33 = vmul.f32 0.25, %v310_v32  ;;  %v501_v34 = vpop.f32.mrb[5].mxu1 }
 0x37c   : > { %v313_v35 = vpop.f32.mrb[6].mxu1 }
 0x37d   : > { %v502_v36 = vpop.f32.mrb[7].mxu1  ;;  %v317_v37 = vsel %vm193_vm2, %v316_v33, -inf }
 0x37e   : > { %318 = vmax.xlane.f32.xlu1 %v317_v37 }
 0x40b   : > { %v319_v38 = vpop.xlane.xlu1 %318 }
 0x40c   : > { %v320_v39 = vsub.f32 %v316_v33, %v319_v38 }
 0x40e   : > { %v321_v40 = vmul.f32 1.442695, %v320_v39 }
 0x410   : > { %548 = vpow2.f32 %v321_v40 }
 0x41a   : > { %v549_v41 = vpop.eup %548 }
 0x41b   : > { %v323_v42 = vsel %vm193_vm2, %v549_v41, 0.0 }
 0x41c   : > { %324 = vadd.xlane.f32.xlu0 %v323_v42 }
 0x432   : > { %329 = vrot.lane.b32.xlu0 %v542_v18, %s582_s21 }
 0x4a9   : > { %v325_v43 = vpop.xlane.xlu0 %324 }
 0x4aa   : > { %550 = vrcp.f32 %v325_v43 }
 0x4ad   : > { %v330_v44 = vpop.permute.xlu0 %329 }
 0x4ae   : > { %v335_v45 = vsel %vm211_vm3, %v330_v44, 0 }
 0x4af   : > { %504 = vmatpush3.bf16.msra.mxu0 %v335_v45 }
 0x4b4   : > { %v551_v46 = vpop.eup %550 }
 0x4b5   : > { %v327_v47 = vmul.f32 %v551_v46, %v549_v41 }
 0x4b7   : > { %v328_v48 = vpack.c.bf16 %v327_v47, %v327_v47 }
 0x4b9   : > { %506 = vmatmul.mubr.msk.bf16.vlgmr.msra.gmra.mrb[4].mxu0 %vm193_vm2, %v328_v48 }
 0x58c   : > { %v371_v49 = vpop.f32.mrb[4].mxu0 }
 0x58d   : > { %v476_v50 = vpack.c.bf16 %v371_v49, %v371_v49  ;;  %v507_v51 = vpop.f32.mrb[5].mxu0 }
 0x58e   : > { %v374_v52 = vpop.f32.mrb[6].mxu0 }
 0x58f   : > { %381 = vrot.lane.b32.xlu0 %v476_v50, %s583_s22  ;;  %v508_v53 = vpop.f32.mrb[7].mxu0 }
 0x601   : > { %v382_v54 = vpop.permute.xlu0 %381 }
 0x602   : > { %385 = vst.msk [vmem:[%s643_s20] sm:$0xf] %vm384_vm5, %v382_v54 }
 0x603 PF: > { %s11_s8 = sadd.s32 1, %s574_s8   ;;  %s662_s6 = smov %s570_s7 }
 0x604   : > { %p8_p5 = scmp.ge.s32.totalorder %s11_s8, 4   ;;  %s663_s7 = smov %s665_s9 }
 0x606   :  { %10 = sbr.rel (!%p8_p5) target bundleno = 2 (0x2), region = 55 }

// kernel: bert_encoder_forward.16
= control target key start
LH: loop header
LB: loop body
LE: loop exit
PB: predicated region body
PF: predicated region fallthrough
CT: control target
= control target key end

     0   :  { %v144_v0 = vmov 0.0   ;;  %vm145_vm0 = vmmov 0   ;;  %vm45_vm1 = vcmask 261120   ;;  %vm108_vm2 = vcmask 519168   ;;  %s184_s1 = inlined_call_operand.vmem [shape: bf16[32,64], index: 1, kind: input, shape index: {}]   ;;  %s185_s0 = inlined_call_operand.vmem [shape: bf16[16,32], index: 0, kind: input, shape index: {}]   ;;  %s186_s2 = inlined_call_operand.vmem [shape: f32[1,64], index: 2, kind: input, shape index: {}]   ;;  %s187_s3 = inlined_call_operand.vmem [shape: bf16[16,64], index: 3, kind: output, shape index: {}]  }
   0x1   :  { %127 = vmatprep.subr.bf16.mxu0 %v144_v0  ;;  %v137_v1 = vld [vmem:[%s184_s1] sm:$0xff]   ;;  %131 = vmatprep.mubr.msk.bf16.mxu0 %vm145_vm0, %v144_v0  ;;  %v138_v2 = vld [vmem:[%s184_s1 + $0x8] sm:$0xff]  }
   0x2   :  { %128 = vmatpush3.bf16.msra.mxu0 %v137_v1  ;;  %v139_v3 = vld [vmem:[%s185_s0] sm:$0xff]  }
   0x3   :  { %129 = vmatprep.subr.bf16.mxu0 %v144_v0  ;;  %v115_v4 = vld [vmem:[%s186_s2] ss:$0 sm:$0xff] }
   0x6   :  { %130 = vmatpush3.bf16.msra.mxu0 %v138_v2 }
   0x9   :  { %132 = vmatmul.mubr.msk.bf16.vlgmr.msra.gmra.mrb[0].mxu0 %vm45_vm1, %v139_v3 }
  0xdc   :  { %v83_v5 = vpop.f32.mrb[0].mxu0 }
  0xdd   :  { %v84_v6 = vadd.f32 %v115_v4, %v83_v5  ;;  %v133_v7 = vpop.f32.mrb[1].mxu0 }
  0xde   :  { %v86_v8 = vpop.f32.mrb[2].mxu0 }
  0xdf   :  { %v92_v9 = vmul.f32 0.70710677, %v84_v6  ;;  %v87_v10 = vadd.f32 %v115_v4, %v86_v8  ;;  %v134_v11 = vpop.f32.mrb[3].mxu0  ;;  %v90_v14 = vmul.f32 0.5, %v84_v6 }
  0xe1   :  { %140 = verf.f32 %v92_v9  ;;  %v93_v12 = vmul.f32 0.70710677, %v87_v10  ;;  %v91_v18 = vmul.f32 0.5, %v87_v10 }
  0xe3   :  { %142 = verf.f32 %v93_v12 }
  0xeb   :  { %v141_v13 = vpop.eup %140 }
  0xec   :  { %v96_v15 = vadd.f32 1.0, %v141_v13 }
  0xed   :  { %v143_v16 = vpop.eup %142 }
  0xee   :  { %v98_v17 = vmul.f32 %v96_v15, %v90_v14  ;;  %v97_v19 = vadd.f32 1.0, %v143_v16 }
  0xf0   :  { %v122_v20 = vpack.c.bf16 %v98_v17, %v98_v17  ;;  %v99_v21 = vmul.f32 %v97_v19, %v91_v18 }
  0xf2   :  { %109 = vst.msk [vmem:[%s187_s3] sm:$0xf] %vm108_vm2, %v122_v20  ;;  %v123_v22 = vpack.c.bf16 %v99_v21, %v99_v21 }
  0xf4   :  { %110 = vst.msk [vmem:[%s187_s3 + $0x4] sm:$0xf] %vm108_vm2, %v123_v22 }

// kernel: bert_encoder_forward.23
= control target key start
LH: loop header
LB: loop body
LE: loop exit
PB: predicated region body
PF: predicated region fallthrough
CT: control target
= control target key end

     0   :  { %v147_v1 = vmov 0.0   ;;  %vm148_vm0 = vmmov 0   ;;  %s194_s0 = inlined_call_operand.vmem [shape: bf16[2,32], index: 0, kind: input, shape index: {}]   ;;  %s195_s1 = inlined_call_operand.vmem [shape: bf16[32,32], index: 1, kind: input, shape index: {}]   ;;  %s196_s2 = inlined_call_operand.vmem [shape: f32[1,32], index: 2, kind: input, shape index: {}]   ;;  %s197_s3 = inlined_call_operand.hbm [shape: f32[2,32], index: 3, kind: output, shape index: {}]  }
   0x1   :  { %v119_v0 = vld [vmem:[%s195_s1] sm:$0xff]   ;;  %108 = vmatprep.subr.bf16.mxu0 %v147_v1  ;;  %v120_v2 = vld [vmem:[%s195_s1 + $0x8] sm:$0xff]   ;;  %112 = vmatprep.mubr.msk.bf16.mxu0 %vm148_vm0, %v147_v1 }
   0x2   :  { %109 = vmatpush3.bf16.msra.mxu0 %v119_v0 }
   0x3   :  { %110 = vmatprep.subr.bf16.mxu0 %v147_v1 }
   0x4   :  { %8 = vsyncpa [#allocation3], 0  ;;  %v16_v3 = vld [vmem:[%s194_s0] sm:$0x1]  ;;  %vm40_vm1 = vcmask 261120   ;;  %s149_s1 = smov [#allocation2]  }
   0x5   :  { %v101_v4 = vld [vmem:[%s196_s2] ss:$0 sm:$0xff]  ;;  %s93_s20 = sshll.u32 %s149_s1, 4  ;;  %vm85_vm2 = vcmask 254976   ;;  %s94_s20 = int_to_ptr.vmem [resolvable:$true] %s93_s20 }
   0x6   :  { %111 = vmatpush3.bf16.msra.mxu0 %v120_v2  ;;  %s123_s21 = scalar_lea.vmem %s94_s20, 32  ;;  %p128_p1 = scmp.lt.s32.totalorder %s94_s20, %s94_s20 }
   0x7   :  { %p124_p0 = scmp.ne.s32.totalorder %s94_s20, %s123_s21  ;;  %p129_p2 = scmp.lt.s32.totalorder %s123_s21, %s123_s21 }
   0x9   :  { %113 = vmatmul.mubr.msk.bf16.vlgmr.msra.gmra.mrb[0].mxu0 %vm40_vm1, %v16_v3  ;;  %p130_p3 = por %p129_p2, %p128_p1 }
   0xb   :  { %p131_p4 = pnand %p130_p3, %p124_p0 }
  0xdc   :  { %v78_v5 = vpop.f32.mrb[0].mxu0 }
  0xdd   :  { %v79_v6 = vadd.f32 %v101_v4, %v78_v5  ;;  %v114_v7 = vpop.f32.mrb[1].mxu0 }
  0xde   :  { %v81_v8 = vpop.f32.mrb[2].mxu0 }
  0xdf   :  { %121 = vtanh.f32 %v79_v6  ;;  %v115_v9 = vpop.f32.mrb[3].mxu0 }
  0xe9   :  { %v122_v10 = vpop.eup %121 }
  0xea   :  { %86 = vst.msk [vmem:[#allocation2] sm:$0x3] %vm85_vm2, %v122_v10 }
  0xeb   :  { %134 = shalt.err (!%p131_p4)
}
  0xec   :  { %s135_s22 = scalar_lea.hbm %s197_s3, 32 }
  0xed   :  { %p136_p5 = scmp.ne.s32.totalorder %s197_s3, %s135_s22  ;;  %p139_p6 = scmp.lt.u32.totalorder %s135_s22, %s197_s3 }
  0xef   :  { %p141_p7 = pnand %p139_p6, %p136_p5 }
  0xf1   :  { %144 = shalt.err (!%p141_p7)
}
  0xf2   :  { %96 = dma.vmem_to_hbm [thread:$0]  %s94_s20, 32, %s197_s3, [#allocation3]  }
  0xf3   :  { %145 = dma.done.wait [#allocation3], 32  }
  0xf4   :  { %146 = vsyncadd [#allocation3], 4294967264 }
  0xf5   :  { %100 = vsyncpa [#allocation3], 1 }

// kernel: bert_encoder_forward.17
= control target key start
LH: loop header
LB: loop body
LE: loop exit
PB: predicated region body
PF: predicated region fallthrough
CT: control target
= control target key end

     0   :  { %v227_v0 = vmov 0.0   ;;  %vm228_vm0 = vmmov 0   ;;  %vm70_vm1 = vcmask 523264   ;;  %vm121_vm2 = vcmask 261120   ;;  %s301_s1 = inlined_call_operand.vmem [shape: bf16[64,32], index: 1, kind: input, shape index: {}]   ;;  %s302_s0 = inlined_call_operand.vmem [shape: bf16[16,64], index: 0, kind: input, shape index: {}]   ;;  %s303_s3 = inlined_call_operand.vmem [shape: bf16[16,32], index: 3, kind: input, shape index: {}]   ;;  %s304_s2 = inlined_call_operand.vmem [shape: f32[1,32], index: 2, kind: input, shape index: {}]   ;;  %s305_s4 = inlined_call_operand.vmem [shape: f32[1,32], index: 4, kind: input, shape index: {}]   ;;  %s306_s5 = inlined_call_operand.vmem [shape: f32[1,32], index: 5, kind: input, shape index: {}]   ;;  %s307_s6 = inlined_call_operand.vmem [shape: bf16[16,32], index: 6, kind: output, shape index: {}]  }
   0x1   :  { %204 = vmatprep.subr.bf16.mxu0 %v227_v0  ;;  %v218_v1 = vld [vmem:[%s301_s1] sm:$0xff]   ;;  %212 = vmatprep.mubr.msk.bf16.mxu0 %vm228_vm0, %v227_v0  ;;  %v219_v2 = vld [vmem:[%s301_s1 + $0x8] sm:$0xff]   ;;  %v220_v3 = vld [vmem:[%s301_s1 + $0x10] sm:$0xff]   ;;  %vm175_vm3 = vcmask 257024  }
   0x2   :  { %205 = vmatpush3.bf16.msra.mxu0 %v218_v1  ;;  %v221_v4 = vld [vmem:[%s301_s1 + $0x18] sm:$0xff]   ;;  %v222_v5 = vld [vmem:[%s302_s0] sm:$0xff]  }
   0x3   :  { %206 = vmatprep.subr.bf16.mxu0 %v227_v0  ;;  %v196_v6 = vld [vmem:[%s303_s3] sm:$0xff]  }
   0x4   :  { %v182_v7 = vld [vmem:[%s304_s2] ss:$0 sm:$0xff]  ;;  %v197_v8 = vunpack.c.l.bf16 %v196_v6  ;;  %v198_v12 = vunpack.c.h.bf16 %v196_v6 }
   0x5   :  { %v189_v37 = vld [vmem:[%s305_s4] ss:$0 sm:$0xff] }
   0x6   :  { %207 = vmatpush3.bf16.msra.mxu0 %v219_v2  ;;  %v190_v39 = vld [vmem:[%s306_s5] ss:$0 sm:$0xff] }
   0x7   :  { %208 = vmatprep.subr.bf16.mxu0 %v227_v0 }
   0xa   :  { %209 = vmatpush3.bf16.msra.mxu0 %v220_v3 }
   0xb   :  { %210 = vmatprep.subr.bf16.mxu0 %v227_v0 }
   0xe   :  { %211 = vmatpush3.bf16.msra.mxu0 %v221_v4 }
  0x11   :  { %213 = vmatmul.mubr.msk.bf16.vlgmr.msra.gmra.mrb[0].mxu0 %vm70_vm1, %v222_v5 }
  0xe4   :  { %v108_v9 = vpop.f32.mrb[0].mxu0 }
  0xe5   :  { %v109_v10 = vadd.f32 %v182_v7, %v108_v9  ;;  %v214_v11 = vpop.f32.mrb[1].mxu0 }
  0xe6   :  { %v111_v13 = vpop.f32.mrb[2].mxu0 }
  0xe7   :  { %v112_v14 = vadd.f32 %v182_v7, %v111_v13  ;;  %v215_v15 = vpop.f32.mrb[3].mxu0  ;;  %v119_v16 = vadd.f32 %v197_v8, %v109_v10 }
  0xe9   :  { %v122_v17 = vsel %vm121_vm2, %v119_v16, 0.0  ;;  %v120_v18 = vadd.f32 %v198_v12, %v112_v14 }
  0xea   :  { %123 = vadd.xlane.f32.xlu0 %v122_v17 }
  0xeb   :  { %v125_v19 = vsel %vm121_vm2, %v120_v18, 0.0 }
  0xee   :  { %126 = vadd.xlane.f32.xlu0 %v125_v19 }
 0x177   :  { %v124_v20 = vpop.xlane.xlu0 %123 }
 0x178   :  { %v129_v21 = vmul.f32 0.03125, %v124_v20 }
 0x17a   :  { %v131_v22 = vsub.f32 %v119_v16, %v129_v21 }
 0x17b   :  { %v127_v23 = vpop.xlane.xlu0 %126 }
 0x17c   :  { %v130_v24 = vmul.f32 0.03125, %v127_v23  ;;  %v133_v25 = vmul.f32 %v131_v22, %v131_v22 }
 0x17e   :  { %v132_v26 = vsub.f32 %v120_v18, %v130_v24  ;;  %v135_v27 = vsel %vm121_vm2, %v133_v25, 0.0 }
 0x17f   :  { %136 = vadd.xlane.f32.xlu1 %v135_v27 }
 0x180   :  { %v134_v28 = vmul.f32 %v132_v26, %v132_v26 }
 0x182   :  { %v138_v29 = vsel %vm121_vm2, %v134_v28, 0.0 }
 0x183   :  { %139 = vadd.xlane.f32.xlu1 %v138_v29 }
 0x20c   :  { %v137_v30 = vpop.xlane.xlu1 %136 }
 0x20d   :  { %v141_v31 = vmul.f32 0.03125, %v137_v30 }
 0x20f   :  { %v143_v32 = vadd.f32 1e-12, %v141_v31 }
 0x210   :  { %v140_v33 = vpop.xlane.xlu1 %139 }
 0x211   :  { %223 = vrsqrt.f32 %v143_v32  ;;  %v142_v34 = vmul.f32 0.03125, %v140_v33 }
 0x213   :  { %v144_v35 = vadd.f32 1e-12, %v142_v34 }
 0x215   :  { %225 = vrsqrt.f32 %v144_v35 }
 0x21b   :  { %v224_v36 = vpop.eup %223 }
 0x21c   :  { %v147_v38 = vmul.f32 %v224_v36, %v131_v22 }
 0x21e   :  { %v156_v40 = vmul.f32 %v189_v37, %v147_v38 }
 0x21f   :  { %v226_v41 = vpop.eup %225 }
 0x220   :  { %v165_v42 = vadd.f32 %v190_v39, %v156_v40  ;;  %v148_v43 = vmul.f32 %v226_v41, %v132_v26 }
 0x222   :  { %v193_v44 = vpack.c.bf16 %v165_v42, %v165_v42  ;;  %v157_v45 = vmul.f32 %v189_v37, %v148_v43 }
 0x224   :  { %176 = vst.msk [vmem:[%s307_s6] sm:$0xf] %vm175_vm3, %v193_v44  ;;  %v166_v46 = vadd.f32 %v190_v39, %v157_v45 }
 0x226   :  { %v194_v47 = vpack.c.bf16 %v166_v46, %v166_v46 }
 0x228   :  { %177 = vst.msk [vmem:[%s307_s6 + $0x4] sm:$0xf] %vm175_vm3, %v194_v47 }

</bundles_post_ra>
